<compile_context>
chip_gen: v6e
topology: v6e:2x2x1
jax: 0.10.0
libtpu: 0.0.40
codegen_flags: <defaults>
</compile_context>

<pallas_src>
import functools

import jax
import jax.numpy as jnp
from jax import lax
from jax.experimental import pallas as pl
from jax.experimental.pallas import tpu as pltpu


def _round_up(x, m):
    return ((x + m - 1) // m) * m


def _sigmoid_via_tanh(x):
    # sigmoid(x) = 0.5 * tanh(0.5*x) + 0.5 : single EUP op + cheap VPU FMA
    return 0.5 * jnp.tanh(0.5 * x) + 0.5


# ----------------------------- LSTM kernel ---------------------------------
# One grid step = time_chunk timesteps for one batch split. gx holds the
# precomputed input-projection gate pre-activations (x @ W_ih^T + b) in bf16,
# so the serial loop only does the hidden-state matmul and gate nonlinearities.
# h is carried in bf16 scratch (feeds the MXU directly), c in f32.

def lstm_chunk_kernel(gx_ref, whh_ref, out_ref, h_scr, c_scr, *, hp, tc, inner):
    @pl.when(pl.program_id(1) == 0)
    def _():
        h_scr[...] = jnp.zeros_like(h_scr)
        c_scr[...] = jnp.zeros_like(c_scr)

    whh = whh_ref[...]                                     # [Hp, 4Hp] bf16

    def step(t, carry):
        h_b, c = carry                                     # bf16 [Bs,Hp], f32 [Bs,Hp]
        gates = jnp.dot(h_b, whh, preferred_element_type=jnp.float32) + gx_ref[t]
        # PyTorch gate order i, f, g, o ; each gate padded to hp lanes.
        i_g = _sigmoid_via_tanh(gates[:, 0 * hp:1 * hp])
        f_g = _sigmoid_via_tanh(gates[:, 1 * hp:2 * hp])
        g_g = jnp.tanh(gates[:, 2 * hp:3 * hp])
        o_g = _sigmoid_via_tanh(gates[:, 3 * hp:4 * hp])
        c_new = f_g * c + i_g * g_g
        h_new = (o_g * jnp.tanh(c_new)).astype(jnp.bfloat16)
        out_ref[t] = h_new
        return (h_new, c_new)

    def outer(s, carry):
        def unrolled(u, carry):
            return step(s * inner + u, carry)
        return lax.fori_loop(0, inner, unrolled, carry, unroll=True)

    h_f, c_f = lax.fori_loop(0, tc // inner, outer,
                             (h_scr[...], c_scr[...]), unroll=False)
    h_scr[...] = h_f
    c_scr[...] = c_f


def lstm_recurrence(gx, whh_t, *, time_chunk, batch_splits=1, inner_unroll=8,
                    vmem_limit_bytes=48 * 1024 * 1024):
    """gx: [Tp, Bp, 4*Hp] bf16 gate pre-activations; whh_t: [Hp, 4*Hp] bf16."""
    Tp, Bp, G = gx.shape
    Hp = G // 4
    if batch_splits < 1 or Bp % (8 * batch_splits) != 0:
        batch_splits = 1                       # keep sublane-aligned batch tiles
    Bs = Bp // batch_splits
    n_chunks = Tp // time_chunk
    inner = min(inner_unroll, time_chunk)      # time_chunk is a multiple of 8
    kernel = functools.partial(lstm_chunk_kernel, hp=Hp, tc=time_chunk,
                               inner=inner)
    return pl.pallas_call(
        kernel,
        out_shape=jax.ShapeDtypeStruct((Tp, Bp, Hp), jnp.bfloat16),
        grid_spec=pltpu.PrefetchScalarGridSpec(
            num_scalar_prefetch=0,
            grid=(batch_splits, n_chunks),
            in_specs=[
                pl.BlockSpec((time_chunk, Bs, 4 * Hp),
                             lambda sb, st: (st, sb, 0)),
                # grid-invariant weight: index (0,0) every step, DMA'd once.
                # (Could be single-buffered via pipeline_mode on VMEM-tight
                # configs; left default for portability.)
                pl.BlockSpec((Hp, 4 * Hp), lambda sb, st: (0, 0)),
            ],
            out_specs=pl.BlockSpec((time_chunk, Bs, Hp),
                                   lambda sb, st: (st, sb, 0)),
            scratch_shapes=[pltpu.VMEM((Bs, Hp), jnp.bfloat16),   # h (bf16)
                            pltpu.VMEM((Bs, Hp), jnp.float32)],   # c (f32)
        ),
        compiler_params=pltpu.CompilerParams(
            dimension_semantics=("parallel", "arbitrary"),  # batch split || time
            vmem_limit_bytes=vmem_limit_bytes),
    )(gx, whh_t)


# ----------------------- fusion + projection kernel ------------------------
# fusion (th + lh) is pre-computed once to a bf16 array; the kernel is a plain
# tiled matmul with bias, tiled with output COLUMNS as the outer (parallel)
# grid axis so each [Hp, tcols] weight tile is loaded once and stays resident
# while the (much smaller) activation row tiles stream past it.

def proj_kernel(fus_ref, w_ref, b_ref, out_ref):
    out_ref[...] = (jnp.dot(fus_ref[...], w_ref[...],
                            preferred_element_type=jnp.float32)
                    + b_ref[...]).astype(out_ref.dtype)


def fused_projection(fus, w_cat, b_cat, *, vmem_limit_bytes=48 * 1024 * 1024):
    """fus: [N, Hp] bf16; w_cat: [Hp, Cp] bf16; b_cat: [1, Cp] f32 -> [N, Cp] bf16."""
    N0, Hp = fus.shape
    Cp = w_cat.shape[1]
    tn = 256 if N0 >= 256 else _round_up(N0, 8)
    Np = _round_up(N0, tn)
    tcols = min(512, Cp)                      # Cp built as a multiple of tcols
    if Np != N0:
        fus = jnp.pad(fus, ((0, Np - N0), (0, 0)))

    out = pl.pallas_call(
        proj_kernel,
        out_shape=jax.ShapeDtypeStruct((Np, Cp), jnp.bfloat16),
        grid_spec=pltpu.PrefetchScalarGridSpec(
            num_scalar_prefetch=0,
            grid=(Cp // tcols, Np // tn),     # columns OUTER -> weight resident
            in_specs=[
                pl.BlockSpec((tn, Hp), lambda j, i: (i, 0)),
                pl.BlockSpec((Hp, tcols), lambda j, i: (0, j)),
                pl.BlockSpec((1, tcols), lambda j, i: (0, j)),
            ],
            out_specs=pl.BlockSpec((tn, tcols), lambda j, i: (i, j)),
        ),
        compiler_params=pltpu.CompilerParams(
            dimension_semantics=("parallel", "arbitrary"),
            vmem_limit_bytes=vmem_limit_bytes),
    )(fus, w_cat, b_cat)
    return out[:N0]


# ----------------------------- parameter init -------------------------------

def init_params(key, *, vocab_size, label_size, emb_dim, rnn_size,
                num_dec_layers, padding_idx, param_init=0.1):
    """Deterministic synthetic init mirroring LMModel._init_params (PyTorch layout)."""
    ks = list(jax.random.split(key, 6 + 4 * num_dec_layers))
    u = lambda k, shape: jax.random.uniform(
        k, shape, jnp.float32, -param_init, param_init)

    params = {
        "embeddings": u(ks[0], (vocab_size, emb_dim)),
        "embed_label": u(ks[1], (label_size, rnn_size)),
        "fc_label_w": u(ks[2], (label_size, rnn_size)),
        "fc_label_b": u(ks[3], (label_size,)),
        "generator_w": u(ks[4], (vocab_size, rnn_size)),   # no bias
        "lstm": [],
    }
    # padding row zeroed, as in _init_params
    params["embeddings"] = params["embeddings"].at[padding_idx].set(0.0)

    for l in range(num_dec_layers):
        in_dim = emb_dim if l == 0 else rnn_size
        k0, k1, k2, k3 = ks[5 + 4 * l: 9 + 4 * l]
        params["lstm"].append({
            "w_ih": u(k0, (4 * rnn_size, in_dim)),
            "w_hh": u(k1, (4 * rnn_size, rnn_size)),
            "b_ih": u(k2, (4 * rnn_size,)),
            "b_hh": u(k3, (4 * rnn_size,)),
        })
    return params


def _pack_gate_weight(w, H, Hp, pad_rows):
    """PyTorch [4H, Din] -> transposed [Din(_padded), 4*Hp] with per-gate lane padding."""
    Din = w.shape[1]
    w4 = w.reshape(4, H, Din)                    # (gate, H, Din), order i,f,g,o
    w4 = jnp.transpose(w4, (2, 0, 1))            # (Din, gate, H)
    w4 = jnp.pad(w4, ((0, 0), (0, 0), (0, Hp - H)))
    w2 = w4.reshape(Din, 4 * Hp)
    if pad_rows and Din < Hp:
        w2 = jnp.pad(w2, ((0, Hp - Din), (0, 0)))
    return w2


def _pack_gate_bias(b_ih, b_hh, H, Hp):
    b = (b_ih + b_hh).reshape(4, H)
    b = jnp.pad(b, ((0, 0), (0, Hp - H)))
    return b.reshape(1, 4 * Hp)


def pack_params(params, *, rnn_size):
    """One-time layout prep: transposes, per-gate lane padding, bf16 casts,
    generator+fc_label weight concatenation (lane-dense output columns)."""
    H = rnn_size
    Hp = _round_up(H, 128)
    V = params["generator_w"].shape[0]
    L = params["fc_label_b"].shape[0]
    Cp0 = _round_up(V + L, 128)
    tcols = 512 if Cp0 >= 512 else Cp0
    Cp = _round_up(Cp0, tcols)

    w_cat = jnp.concatenate([params["generator_w"].T,          # [H, V]
                             params["fc_label_w"].T], axis=1)  # [H, V+L]
    w_cat = jnp.pad(w_cat, ((0, Hp - H), (0, Cp - (V + L))))
    b_cat = jnp.concatenate([jnp.zeros((V,), jnp.float32),
                             params["fc_label_b"],
                             jnp.zeros((Cp - V - L,), jnp.float32)])[None, :]

    layers = []
    for li, layer in enumerate(params["lstm"]):
        layers.append({
            "w_ih_t": _pack_gate_weight(layer["w_ih"], H, Hp,
                                        pad_rows=(li > 0)).astype(jnp.bfloat16),
            "w_hh_t": _pack_gate_weight(layer["w_hh"], H, Hp,
                                        pad_rows=True).astype(jnp.bfloat16),
            "b": _pack_gate_bias(layer["b_ih"], layer["b_hh"], H, Hp),
        })

    embed_label_p = jnp.pad(params["embed_label"], ((0, 0), (0, Hp - H)))
    return {
        "embeddings": params["embeddings"],
        "embed_label_p": embed_label_p,
        "w_cat": w_cat.astype(jnp.bfloat16),
        "b_cat": b_cat,
        "lstm": layers,
    }


# ----------------------------- model forward --------------------------------

@functools.partial(jax.jit,
                   static_argnames=("vocab_size", "label_size",
                                    "time_chunk", "batch_splits"))
def lm_forward(packed, text, label, *, vocab_size, label_size,
               time_chunk=32, batch_splits=1):
    """text, label: [T, B] int32 -> (text_logits [T,B,V], label_logits [T,B,L]) bf16."""
    T, B = text.shape
    Hp = packed["embed_label_p"].shape[1]
    Bp = _round_up(max(B, 8), 8)

    # Derive the actual chunk size: honor the request, but never exceed the
    # (8-rounded) sequence length, and keep the double-buffered bf16 gx+out
    # blocks within ~16 MiB so the kernel fits v7x's smaller VMEM comfortably.
    time_chunk = _round_up(max(time_chunk, 8), 8)
    per_step_bytes = Bp * (4 * Hp + Hp) * 2                 # bf16 gx + out, 1 step
    budget = 16 * 1024 * 1024
    max_tc = max(8, (budget // (2 * per_step_bytes)) // 8 * 8)
    tcn = min(time_chunk, max_tc, _round_up(T, 8))
    Tp = _round_up(T, tcn)

    # token embedding (f32 table, padding_idx row is zero)
    x = jnp.take(packed["embeddings"], text, axis=0)              # [T, B, E]

    h = None
    for li, layer in enumerate(packed["lstm"]):
        if li == 0:
            xin = x.astype(jnp.bfloat16).reshape(T * B, -1)
            gx = (jnp.dot(xin, layer["w_ih_t"],
                          preferred_element_type=jnp.float32)
                  .reshape(T, B, 4 * Hp) + layer["b"])
            gx = jnp.pad(gx.astype(jnp.bfloat16),
                         ((0, Tp - T), (0, Bp - B), (0, 0)))       # zero pads
        else:
            hin = h.reshape(Tp * Bp, Hp)                           # already bf16
            gx = (jnp.dot(hin, layer["w_ih_t"],
                          preferred_element_type=jnp.float32)
                  .reshape(Tp, Bp, 4 * Hp) + layer["b"]).astype(jnp.bfloat16)
        h = lstm_recurrence(gx, layer["w_hh_t"], time_chunk=tcn,
                            batch_splits=batch_splits)

    text_hidden = h[:T]                                            # [T, Bp, Hp] bf16
    label_hidden = jnp.take(packed["embed_label_p"], label, axis=0)  # [T, B, Hp] f32
    label_hidden = jnp.pad(label_hidden, ((0, 0), (0, Bp - B), (0, 0)))

    # pre-fuse once (f32 add, bf16 storage) -> single activation stream
    fusion = (text_hidden.astype(jnp.float32) + label_hidden).astype(jnp.bfloat16)
    logits = fused_projection(fusion.reshape(T * Bp, Hp),
                              packed["w_cat"], packed["b_cat"])
    # TODO(synk): emitting two separately padded per-head outputs directly from
    # the kernel would avoid this pad-strip slice for very large vocabularies.
    logits = logits.reshape(T, Bp, -1)[:, :B]
    V, L = vocab_size, label_size
    return logits[..., :V], logits[..., V:V + L]


if __name__ == "__main__":
    # small, forward-consistent shapes
    T, B = 8, 2
    vocab_size, label_size = 50, 7
    emb_dim, rnn_size = 16, 32
    num_dec_layers = 2
    padding_idx = 1

    key = jax.random.PRNGKey(0)
    kp, kt, kl = jax.random.split(key, 3)

    params = init_params(kp,
                         vocab_size=vocab_size, label_size=label_size,
                         emb_dim=emb_dim, rnn_size=rnn_size,
                         num_dec_layers=num_dec_layers,
                         padding_idx=padding_idx, param_init=0.1)
    packed = pack_params(params, rnn_size=rnn_size)   # one-time weight prep

    text = jax.random.randint(kt, (T, B), 0, vocab_size, dtype=jnp.int32)
    label = jax.random.randint(kl, (T, B), 0, label_size, dtype=jnp.int32)

    # batch_splits=1 here (tiny batch); set 2 on v7x with Bp >= 16 to run the
    # recurrence on both TensorCores.
    text_logits, label_logits = lm_forward(
        packed, text, label, vocab_size=vocab_size, label_size=label_size,
        time_chunk=32, batch_splits=1)
    jax.block_until_ready(text_logits)
    jax.block_until_ready(label_logits)

    assert text_logits.shape == (T, B, vocab_size)
    assert label_logits.shape == (T, B, label_size)
    assert bool(jnp.all(jnp.isfinite(text_logits.astype(jnp.float32))))
    assert bool(jnp.all(jnp.isfinite(label_logits.astype(jnp.float32))))
    print("KERNEL_OK")
</pallas_src>

<mosaic_0001>
module attributes {stable_mosaic.version = 11 : i64} {
  func.func @lstm_chunk_kernel(%arg0: i32, %arg1: i32, %arg2: memref<8x8x512xbf16, #tpu.memory_space<vmem>>, %arg3: memref<128x512xbf16, #tpu.memory_space<vmem>>, %arg4: memref<8x8x128xbf16, #tpu.memory_space<vmem>>, %arg5: memref<8x128xbf16, #tpu.memory_space<vmem>>, %arg6: memref<8x128xf32, #tpu.memory_space<vmem>>) attributes {dimension_semantics = [#tpu.dimension_semantics<parallel>, #tpu.dimension_semantics<arbitrary>], iteration_bounds = array<i64: 1, 1>, scalar_prefetch = 0 : i64, scratch_operands = 2 : i64, tpu.core_type = #tpu.core_type<tc>, window_params = [{transform_indices = @transform_0, window_bounds = array<i64: 8, 8, 512>}, {pipeline_mode = #tpu.pipeline_mode<synchronous>, transform_indices = @transform_1, window_bounds = array<i64: 128, 512>}, {transform_indices = @transform_2, window_bounds = array<i64: 8, 8, 128>}]} {
    %c0_i32 = arith.constant 0 : i32
    %0 = arith.cmpi eq, %arg1, %c0_i32 : i32
    %1 = arith.extui %0 : i1 to i32
    %c0_i32_0 = arith.constant 0 : i32
    %2 = arith.cmpi ne, %1, %c0_i32_0 : i32
    scf.if %2 {
      %cst_132 = arith.constant 0.000000e+00 : bf16
      %360 = vector.broadcast %cst_132 : bf16 to vector<8x128xbf16>
      %c0_133 = arith.constant 0 : index
      %c0_134 = arith.constant 0 : index
      %361 = vector.load %arg5[%c0_133, %c0_134] : memref<8x128xbf16, #tpu.memory_space<vmem>>, vector<8x128xbf16>
      tpu.vector_store %arg5[%c0_133, %c0_134], %360 {strides = array<i32>} : memref<8x128xbf16, #tpu.memory_space<vmem>>, vector<8x128xbf16>,
      %cst_135 = arith.constant 0.000000e+00 : f32
      %362 = vector.broadcast %cst_135 : f32 to vector<8x128xf32>
      %c0_136 = arith.constant 0 : index
      %c0_137 = arith.constant 0 : index
      %363 = vector.load %arg6[%c0_136, %c0_137] : memref<8x128xf32, #tpu.memory_space<vmem>>, vector<8x128xf32>
      tpu.vector_store %arg6[%c0_136, %c0_137], %362 {strides = array<i32>} : memref<8x128xf32, #tpu.memory_space<vmem>>, vector<8x128xf32>,
    } else {
    }
    %c0 = arith.constant 0 : index
    %c0_1 = arith.constant 0 : index
    %3 = vector.load %arg3[%c0, %c0_1] : memref<128x512xbf16, #tpu.memory_space<vmem>>, vector<128x512xbf16>
    %c0_2 = arith.constant 0 : index
    %c0_3 = arith.constant 0 : index
    %4 = vector.load %arg5[%c0_2, %c0_3] : memref<8x128xbf16, #tpu.memory_space<vmem>>, vector<8x128xbf16>
    %c0_4 = arith.constant 0 : index
    %c0_5 = arith.constant 0 : index
    %5 = vector.load %arg6[%c0_4, %c0_5] : memref<8x128xf32, #tpu.memory_space<vmem>>, vector<8x128xf32>
    %c0_i32_6 = arith.constant 0 : i32
    %c0_i32_7 = arith.constant 0 : i32
    %c8_i32 = arith.constant 8 : i32
    %6 = arith.muli %c0_i32_6, %c8_i32 : i32
    %7 = arith.addi %6, %c0_i32_7 : i32
    %cst = arith.constant dense<0.000000e+00> : vector<8x512xf32>
    %8 = tpu.matmul %4, %3, %cst {dimension_numbers = #tpu.dot_dimension_numbers<[1], [0], [0], [1], [0, 0, 1, 1], [], []>} : vector<8x128xbf16>, vector<128x512xbf16>, vector<8x512xf32> -> vector<8x512xf32>
    %9 = arith.index_cast %7 : i32 to index
    %c0_8 = arith.constant 0 : index
    %c0_9 = arith.constant 0 : index
    %10 = vector.load %arg2[%9, %c0_8, %c0_9] : memref<8x8x512xbf16, #tpu.memory_space<vmem>>, vector<1x8x512xbf16>
    %11 = vector.shape_cast %10 : vector<1x8x512xbf16> to vector<8x512xbf16>
    %12 = arith.extf %11 : vector<8x512xbf16> to vector<8x512xf32>
    %13 = arith.addf %8, %12 : vector<8x512xf32>
    %14 = vector.extract_strided_slice %13 {offsets = [0, 0], sizes = [8, 128], strides = [1, 1]} : vector<8x512xf32> to vector<8x128xf32>
    %cst_10 = arith.constant 5.000000e-01 : f32
    %15 = vector.broadcast %cst_10 : f32 to vector<8x128xf32>
    %16 = arith.mulf %15, %14 : vector<8x128xf32>
    %17 = math.tanh %16 : vector<8x128xf32>
    %cst_11 = arith.constant 5.000000e-01 : f32
    %18 = vector.broadcast %cst_11 : f32 to vector<8x128xf32>
    %19 = arith.mulf %18, %17 : vector<8x128xf32>
    %cst_12 = arith.constant 5.000000e-01 : f32
    %20 = vector.broadcast %cst_12 : f32 to vector<8x128xf32>
    %21 = arith.addf %19, %20 : vector<8x128xf32>
    %22 = vector.extract_strided_slice %13 {offsets = [0, 128], sizes = [8, 128], strides = [1, 1]} : vector<8x512xf32> to vector<8x128xf32>
    %cst_13 = arith.constant 5.000000e-01 : f32
    %23 = vector.broadcast %cst_13 : f32 to vector<8x128xf32>
    %24 = arith.mulf %23, %22 : vector<8x128xf32>
    %25 = math.tanh %24 : vector<8x128xf32>
    %cst_14 = arith.constant 5.000000e-01 : f32
    %26 = vector.broadcast %cst_14 : f32 to vector<8x128xf32>
    %27 = arith.mulf %26, %25 : vector<8x128xf32>
    %cst_15 = arith.constant 5.000000e-01 : f32
    %28 = vector.broadcast %cst_15 : f32 to vector<8x128xf32>
    %29 = arith.addf %27, %28 : vector<8x128xf32>
    %30 = vector.extract_strided_slice %13 {offsets = [0, 256], sizes = [8, 128], strides = [1, 1]} : vector<8x512xf32> to vector<8x128xf32>
    %31 = math.tanh %30 : vector<8x128xf32>
    %32 = vector.extract_strided_slice %13 {offsets = [0, 384], sizes = [8, 128], strides = [1, 1]} : vector<8x512xf32> to vector<8x128xf32>
    %cst_16 = arith.constant 5.000000e-01 : f32
    %33 = vector.broadcast %cst_16 : f32 to vector<8x128xf32>
    %34 = arith.mulf %33, %32 : vector<8x128xf32>
    %35 = math.tanh %34 : vector<8x128xf32>
    %cst_17 = arith.constant 5.000000e-01 : f32
    %36 = vector.broadcast %cst_17 : f32 to vector<8x128xf32>
    %37 = arith.mulf %36, %35 : vector<8x128xf32>
    %cst_18 = arith.constant 5.000000e-01 : f32
    %38 = vector.broadcast %cst_18 : f32 to vector<8x128xf32>
    %39 = arith.addf %37, %38 : vector<8x128xf32>
    %40 = arith.mulf %29, %5 : vector<8x128xf32>
    %41 = arith.mulf %21, %31 : vector<8x128xf32>
    %42 = arith.addf %40, %41 : vector<8x128xf32>
    %43 = math.tanh %42 : vector<8x128xf32>
    %44 = arith.mulf %39, %43 : vector<8x128xf32>
    %45 = arith.truncf %44 : vector<8x128xf32> to vector<8x128xbf16>
    %46 = arith.index_cast %7 : i32 to index
    %c0_19 = arith.constant 0 : index
    %c0_20 = arith.constant 0 : index
    %47 = vector.load %arg4[%46, %c0_19, %c0_20] : memref<8x8x128xbf16, #tpu.memory_space<vmem>>, vector<1x8x128xbf16>
    %48 = vector.shape_cast %47 : vector<1x8x128xbf16> to vector<8x128xbf16>
    %49 = vector.shape_cast %45 : vector<8x128xbf16> to vector<1x8x128xbf16>
    tpu.vector_store %arg4[%46, %c0_19, %c0_20], %49 {strides = array<i32>} : memref<8x8x128xbf16, #tpu.memory_space<vmem>>, vector<1x8x128xbf16>,
    %c1_i32 = arith.constant 1 : i32
    %c8_i32_21 = arith.constant 8 : i32
    %50 = arith.muli %c0_i32_6, %c8_i32_21 : i32
    %51 = arith.addi %50, %c1_i32 : i32
    %cst_22 = arith.constant dense<0.000000e+00> : vector<8x512xf32>
    %52 = tpu.matmul %45, %3, %cst_22 {dimension_numbers = #tpu.dot_dimension_numbers<[1], [0], [0], [1], [0, 0, 1, 1], [], []>} : vector<8x128xbf16>, vector<128x512xbf16>, vector<8x512xf32> -> vector<8x512xf32>
    %53 = arith.index_cast %51 : i32 to index
    %c0_23 = arith.constant 0 : index
    %c0_24 = arith.constant 0 : index
    %54 = vector.load %arg2[%53, %c0_23, %c0_24] : memref<8x8x512xbf16, #tpu.memory_space<vmem>>, vector<1x8x512xbf16>
    %55 = vector.shape_cast %54 : vector<1x8x512xbf16> to vector<8x512xbf16>
    %56 = arith.extf %55 : vector<8x512xbf16> to vector<8x512xf32>
    %57 = arith.addf %52, %56 : vector<8x512xf32>
    %58 = vector.extract_strided_slice %57 {offsets = [0, 0], sizes = [8, 128], strides = [1, 1]} : vector<8x512xf32> to vector<8x128xf32>
    %cst_25 = arith.constant 5.000000e-01 : f32
    %59 = vector.broadcast %cst_25 : f32 to vector<8x128xf32>
    %60 = arith.mulf %59, %58 : vector<8x128xf32>
    %61 = math.tanh %60 : vector<8x128xf32>
    %cst_26 = arith.constant 5.000000e-01 : f32
    %62 = vector.broadcast %cst_26 : f32 to vector<8x128xf32>
    %63 = arith.mulf %62, %61 : vector<8x128xf32>
    %cst_27 = arith.constant 5.000000e-01 : f32
    %64 = vector.broadcast %cst_27 : f32 to vector<8x128xf32>
    %65 = arith.addf %63, %64 : vector<8x128xf32>
    %66 = vector.extract_strided_slice %57 {offsets = [0, 128], sizes = [8, 128], strides = [1, 1]} : vector<8x512xf32> to vector<8x128xf32>
    %cst_28 = arith.constant 5.000000e-01 : f32
    %67 = vector.broadcast %cst_28 : f32 to vector<8x128xf32>
    %68 = arith.mulf %67, %66 : vector<8x128xf32>
    %69 = math.tanh %68 : vector<8x128xf32>
    %cst_29 = arith.constant 5.000000e-01 : f32
    %70 = vector.broadcast %cst_29 : f32 to vector<8x128xf32>
    %71 = arith.mulf %70, %69 : vector<8x128xf32>
    %cst_30 = arith.constant 5.000000e-01 : f32
    %72 = vector.broadcast %cst_30 : f32 to vector<8x128xf32>
    %73 = arith.addf %71, %72 : vector<8x128xf32>
    %74 = vector.extract_strided_slice %57 {offsets = [0, 256], sizes = [8, 128], strides = [1, 1]} : vector<8x512xf32> to vector<8x128xf32>
    %75 = math.tanh %74 : vector<8x128xf32>
    %76 = vector.extract_strided_slice %57 {offsets = [0, 384], sizes = [8, 128], strides = [1, 1]} : vector<8x512xf32> to vector<8x128xf32>
    %cst_31 = arith.constant 5.000000e-01 : f32
    %77 = vector.broadcast %cst_31 : f32 to vector<8x128xf32>
    %78 = arith.mulf %77, %76 : vector<8x128xf32>
    %79 = math.tanh %78 : vector<8x128xf32>
    %cst_32 = arith.constant 5.000000e-01 : f32
    %80 = vector.broadcast %cst_32 : f32 to vector<8x128xf32>
    %81 = arith.mulf %80, %79 : vector<8x128xf32>
    %cst_33 = arith.constant 5.000000e-01 : f32
    %82 = vector.broadcast %cst_33 : f32 to vector<8x128xf32>
    %83 = arith.addf %81, %82 : vector<8x128xf32>
    %84 = arith.mulf %73, %42 : vector<8x128xf32>
    %85 = arith.mulf %65, %75 : vector<8x128xf32>
    %86 = arith.addf %84, %85 : vector<8x128xf32>
    %87 = math.tanh %86 : vector<8x128xf32>
    %88 = arith.mulf %83, %87 : vector<8x128xf32>
    %89 = arith.truncf %88 : vector<8x128xf32> to vector<8x128xbf16>
    %90 = arith.index_cast %51 : i32 to index
    %c0_34 = arith.constant 0 : index
    %c0_35 = arith.constant 0 : index
    %91 = vector.load %arg4[%90, %c0_34, %c0_35] : memref<8x8x128xbf16, #tpu.memory_space<vmem>>, vector<1x8x128xbf16>
    %92 = vector.shape_cast %91 : vector<1x8x128xbf16> to vector<8x128xbf16>
    %93 = vector.shape_cast %89 : vector<8x128xbf16> to vector<1x8x128xbf16>
    tpu.vector_store %arg4[%90, %c0_34, %c0_35], %93 {strides = array<i32>} : memref<8x8x128xbf16, #tpu.memory_space<vmem>>, vector<1x8x128xbf16>,
    %c2_i32 = arith.constant 2 : i32
    %c8_i32_36 = arith.constant 8 : i32
    %94 = arith.muli %c0_i32_6, %c8_i32_36 : i32
    %95 = arith.addi %94, %c2_i32 : i32
    %cst_37 = arith.constant dense<0.000000e+00> : vector<8x512xf32>
    %96 = tpu.matmul %89, %3, %cst_37 {dimension_numbers = #tpu.dot_dimension_numbers<[1], [0], [0], [1], [0, 0, 1, 1], [], []>} : vector<8x128xbf16>, vector<128x512xbf16>, vector<8x512xf32> -> vector<8x512xf32>
    %97 = arith.index_cast %95 : i32 to index
    %c0_38 = arith.constant 0 : index
    %c0_39 = arith.constant 0 : index
    %98 = vector.load %arg2[%97, %c0_38, %c0_39] : memref<8x8x512xbf16, #tpu.memory_space<vmem>>, vector<1x8x512xbf16>
    %99 = vector.shape_cast %98 : vector<1x8x512xbf16> to vector<8x512xbf16>
    %100 = arith.extf %99 : vector<8x512xbf16> to vector<8x512xf32>
    %101 = arith.addf %96, %100 : vector<8x512xf32>
    %102 = vector.extract_strided_slice %101 {offsets = [0, 0], sizes = [8, 128], strides = [1, 1]} : vector<8x512xf32> to vector<8x128xf32>
    %cst_40 = arith.constant 5.000000e-01 : f32
    %103 = vector.broadcast %cst_40 : f32 to vector<8x128xf32>
    %104 = arith.mulf %103, %102 : vector<8x128xf32>
    %105 = math.tanh %104 : vector<8x128xf32>
    %cst_41 = arith.constant 5.000000e-01 : f32
    %106 = vector.broadcast %cst_41 : f32 to vector<8x128xf32>
    %107 = arith.mulf %106, %105 : vector<8x128xf32>
    %cst_42 = arith.constant 5.000000e-01 : f32
    %108 = vector.broadcast %cst_42 : f32 to vector<8x128xf32>
    %109 = arith.addf %107, %108 : vector<8x128xf32>
    %110 = vector.extract_strided_slice %101 {offsets = [0, 128], sizes = [8, 128], strides = [1, 1]} : vector<8x512xf32> to vector<8x128xf32>
    %cst_43 = arith.constant 5.000000e-01 : f32
    %111 = vector.broadcast %cst_43 : f32 to vector<8x128xf32>
    %112 = arith.mulf %111, %110 : vector<8x128xf32>
    %113 = math.tanh %112 : vector<8x128xf32>
    %cst_44 = arith.constant 5.000000e-01 : f32
    %114 = vector.broadcast %cst_44 : f32 to vector<8x128xf32>
    %115 = arith.mulf %114, %113 : vector<8x128xf32>
    %cst_45 = arith.constant 5.000000e-01 : f32
    %116 = vector.broadcast %cst_45 : f32 to vector<8x128xf32>
    %117 = arith.addf %115, %116 : vector<8x128xf32>
    %118 = vector.extract_strided_slice %101 {offsets = [0, 256], sizes = [8, 128], strides = [1, 1]} : vector<8x512xf32> to vector<8x128xf32>
    %119 = math.tanh %118 : vector<8x128xf32>
    %120 = vector.extract_strided_slice %101 {offsets = [0, 384], sizes = [8, 128], strides = [1, 1]} : vector<8x512xf32> to vector<8x128xf32>
    %cst_46 = arith.constant 5.000000e-01 : f32
    %121 = vector.broadcast %cst_46 : f32 to vector<8x128xf32>
    %122 = arith.mulf %121, %120 : vector<8x128xf32>
    %123 = math.tanh %122 : vector<8x128xf32>
    %cst_47 = arith.constant 5.000000e-01 : f32
    %124 = vector.broadcast %cst_47 : f32 to vector<8x128xf32>
    %125 = arith.mulf %124, %123 : vector<8x128xf32>
    %cst_48 = arith.constant 5.000000e-01 : f32
    %126 = vector.broadcast %cst_48 : f32 to vector<8x128xf32>
    %127 = arith.addf %125, %126 : vector<8x128xf32>
    %128 = arith.mulf %117, %86 : vector<8x128xf32>
    %129 = arith.mulf %109, %119 : vector<8x128xf32>
    %130 = arith.addf %128, %129 : vector<8x128xf32>
    %131 = math.tanh %130 : vector<8x128xf32>
    %132 = arith.mulf %127, %131 : vector<8x128xf32>
    %133 = arith.truncf %132 : vector<8x128xf32> to vector<8x128xbf16>
    %134 = arith.index_cast %95 : i32 to index
    %c0_49 = arith.constant 0 : index
    %c0_50 = arith.constant 0 : index
    %135 = vector.load %arg4[%134, %c0_49, %c0_50] : memref<8x8x128xbf16, #tpu.memory_space<vmem>>, vector<1x8x128xbf16>
    %136 = vector.shape_cast %135 : vector<1x8x128xbf16> to vector<8x128xbf16>
    %137 = vector.shape_cast %133 : vector<8x128xbf16> to vector<1x8x128xbf16>
    tpu.vector_store %arg4[%134, %c0_49, %c0_50], %137 {strides = array<i32>} : memref<8x8x128xbf16, #tpu.memory_space<vmem>>, vector<1x8x128xbf16>,
    %c3_i32 = arith.constant 3 : i32
    %c8_i32_51 = arith.constant 8 : i32
    %138 = arith.muli %c0_i32_6, %c8_i32_51 : i32
    %139 = arith.addi %138, %c3_i32 : i32
    %cst_52 = arith.constant dense<0.000000e+00> : vector<8x512xf32>
    %140 = tpu.matmul %133, %3, %cst_52 {dimension_numbers = #tpu.dot_dimension_numbers<[1], [0], [0], [1], [0, 0, 1, 1], [], []>} : vector<8x128xbf16>, vector<128x512xbf16>, vector<8x512xf32> -> vector<8x512xf32>
    %141 = arith.index_cast %139 : i32 to index
    %c0_53 = arith.constant 0 : index
    %c0_54 = arith.constant 0 : index
    %142 = vector.load %arg2[%141, %c0_53, %c0_54] : memref<8x8x512xbf16, #tpu.memory_space<vmem>>, vector<1x8x512xbf16>
    %143 = vector.shape_cast %142 : vector<1x8x512xbf16> to vector<8x512xbf16>
    %144 = arith.extf %143 : vector<8x512xbf16> to vector<8x512xf32>
    %145 = arith.addf %140, %144 : vector<8x512xf32>
    %146 = vector.extract_strided_slice %145 {offsets = [0, 0], sizes = [8, 128], strides = [1, 1]} : vector<8x512xf32> to vector<8x128xf32>
    %cst_55 = arith.constant 5.000000e-01 : f32
    %147 = vector.broadcast %cst_55 : f32 to vector<8x128xf32>
    %148 = arith.mulf %147, %146 : vector<8x128xf32>
    %149 = math.tanh %148 : vector<8x128xf32>
    %cst_56 = arith.constant 5.000000e-01 : f32
    %150 = vector.broadcast %cst_56 : f32 to vector<8x128xf32>
    %151 = arith.mulf %150, %149 : vector<8x128xf32>
    %cst_57 = arith.constant 5.000000e-01 : f32
    %152 = vector.broadcast %cst_57 : f32 to vector<8x128xf32>
    %153 = arith.addf %151, %152 : vector<8x128xf32>
    %154 = vector.extract_strided_slice %145 {offsets = [0, 128], sizes = [8, 128], strides = [1, 1]} : vector<8x512xf32> to vector<8x128xf32>
    %cst_58 = arith.constant 5.000000e-01 : f32
    %155 = vector.broadcast %cst_58 : f32 to vector<8x128xf32>
    %156 = arith.mulf %155, %154 : vector<8x128xf32>
    %157 = math.tanh %156 : vector<8x128xf32>
    %cst_59 = arith.constant 5.000000e-01 : f32
    %158 = vector.broadcast %cst_59 : f32 to vector<8x128xf32>
    %159 = arith.mulf %158, %157 : vector<8x128xf32>
    %cst_60 = arith.constant 5.000000e-01 : f32
    %160 = vector.broadcast %cst_60 : f32 to vector<8x128xf32>
    %161 = arith.addf %159, %160 : vector<8x128xf32>
    %162 = vector.extract_strided_slice %145 {offsets = [0, 256], sizes = [8, 128], strides = [1, 1]} : vector<8x512xf32> to vector<8x128xf32>
    %163 = math.tanh %162 : vector<8x128xf32>
    %164 = vector.extract_strided_slice %145 {offsets = [0, 384], sizes = [8, 128], strides = [1, 1]} : vector<8x512xf32> to vector<8x128xf32>
    %cst_61 = arith.constant 5.000000e-01 : f32
    %165 = vector.broadcast %cst_61 : f32 to vector<8x128xf32>
    %166 = arith.mulf %165, %164 : vector<8x128xf32>
    %167 = math.tanh %166 : vector<8x128xf32>
    %cst_62 = arith.constant 5.000000e-01 : f32
    %168 = vector.broadcast %cst_62 : f32 to vector<8x128xf32>
    %169 = arith.mulf %168, %167 : vector<8x128xf32>
    %cst_63 = arith.constant 5.000000e-01 : f32
    %170 = vector.broadcast %cst_63 : f32 to vector<8x128xf32>
    %171 = arith.addf %169, %170 : vector<8x128xf32>
    %172 = arith.mulf %161, %130 : vector<8x128xf32>
    %173 = arith.mulf %153, %163 : vector<8x128xf32>
    %174 = arith.addf %172, %173 : vector<8x128xf32>
    %175 = math.tanh %174 : vector<8x128xf32>
    %176 = arith.mulf %171, %175 : vector<8x128xf32>
    %177 = arith.truncf %176 : vector<8x128xf32> to vector<8x128xbf16>
    %178 = arith.index_cast %139 : i32 to index
    %c0_64 = arith.constant 0 : index
    %c0_65 = arith.constant 0 : index
    %179 = vector.load %arg4[%178, %c0_64, %c0_65] : memref<8x8x128xbf16, #tpu.memory_space<vmem>>, vector<1x8x128xbf16>
    %180 = vector.shape_cast %179 : vector<1x8x128xbf16> to vector<8x128xbf16>
    %181 = vector.shape_cast %177 : vector<8x128xbf16> to vector<1x8x128xbf16>
    tpu.vector_store %arg4[%178, %c0_64, %c0_65], %181 {strides = array<i32>} : memref<8x8x128xbf16, #tpu.memory_space<vmem>>, vector<1x8x128xbf16>,
    %c4_i32 = arith.constant 4 : i32
    %c8_i32_66 = arith.constant 8 : i32
    %182 = arith.muli %c0_i32_6, %c8_i32_66 : i32
    %183 = arith.addi %182, %c4_i32 : i32
    %cst_67 = arith.constant dense<0.000000e+00> : vector<8x512xf32>
    %184 = tpu.matmul %177, %3, %cst_67 {dimension_numbers = #tpu.dot_dimension_numbers<[1], [0], [0], [1], [0, 0, 1, 1], [], []>} : vector<8x128xbf16>, vector<128x512xbf16>, vector<8x512xf32> -> vector<8x512xf32>
    %185 = arith.index_cast %183 : i32 to index
    %c0_68 = arith.constant 0 : index
    %c0_69 = arith.constant 0 : index
    %186 = vector.load %arg2[%185, %c0_68, %c0_69] : memref<8x8x512xbf16, #tpu.memory_space<vmem>>, vector<1x8x512xbf16>
    %187 = vector.shape_cast %186 : vector<1x8x512xbf16> to vector<8x512xbf16>
    %188 = arith.extf %187 : vector<8x512xbf16> to vector<8x512xf32>
    %189 = arith.addf %184, %188 : vector<8x512xf32>
    %190 = vector.extract_strided_slice %189 {offsets = [0, 0], sizes = [8, 128], strides = [1, 1]} : vector<8x512xf32> to vector<8x128xf32>
    %cst_70 = arith.constant 5.000000e-01 : f32
    %191 = vector.broadcast %cst_70 : f32 to vector<8x128xf32>
    %192 = arith.mulf %191, %190 : vector<8x128xf32>
    %193 = math.tanh %192 : vector<8x128xf32>
    %cst_71 = arith.constant 5.000000e-01 : f32
    %194 = vector.broadcast %cst_71 : f32 to vector<8x128xf32>
    %195 = arith.mulf %194, %193 : vector<8x128xf32>
    %cst_72 = arith.constant 5.000000e-01 : f32
    %196 = vector.broadcast %cst_72 : f32 to vector<8x128xf32>
    %197 = arith.addf %195, %196 : vector<8x128xf32>
    %198 = vector.extract_strided_slice %189 {offsets = [0, 128], sizes = [8, 128], strides = [1, 1]} : vector<8x512xf32> to vector<8x128xf32>
    %cst_73 = arith.constant 5.000000e-01 : f32
    %199 = vector.broadcast %cst_73 : f32 to vector<8x128xf32>
    %200 = arith.mulf %199, %198 : vector<8x128xf32>
    %201 = math.tanh %200 : vector<8x128xf32>
    %cst_74 = arith.constant 5.000000e-01 : f32
    %202 = vector.broadcast %cst_74 : f32 to vector<8x128xf32>
    %203 = arith.mulf %202, %201 : vector<8x128xf32>
    %cst_75 = arith.constant 5.000000e-01 : f32
    %204 = vector.broadcast %cst_75 : f32 to vector<8x128xf32>
    %205 = arith.addf %203, %204 : vector<8x128xf32>
    %206 = vector.extract_strided_slice %189 {offsets = [0, 256], sizes = [8, 128], strides = [1, 1]} : vector<8x512xf32> to vector<8x128xf32>
    %207 = math.tanh %206 : vector<8x128xf32>
    %208 = vector.extract_strided_slice %189 {offsets = [0, 384], sizes = [8, 128], strides = [1, 1]} : vector<8x512xf32> to vector<8x128xf32>
    %cst_76 = arith.constant 5.000000e-01 : f32
    %209 = vector.broadcast %cst_76 : f32 to vector<8x128xf32>
    %210 = arith.mulf %209, %208 : vector<8x128xf32>
    %211 = math.tanh %210 : vector<8x128xf32>
    %cst_77 = arith.constant 5.000000e-01 : f32
    %212 = vector.broadcast %cst_77 : f32 to vector<8x128xf32>
    %213 = arith.mulf %212, %211 : vector<8x128xf32>
    %cst_78 = arith.constant 5.000000e-01 : f32
    %214 = vector.broadcast %cst_78 : f32 to vector<8x128xf32>
    %215 = arith.addf %213, %214 : vector<8x128xf32>
    %216 = arith.mulf %205, %174 : vector<8x128xf32>
    %217 = arith.mulf %197, %207 : vector<8x128xf32>
    %218 = arith.addf %216, %217 : vector<8x128xf32>
    %219 = math.tanh %218 : vector<8x128xf32>
    %220 = arith.mulf %215, %219 : vector<8x128xf32>
    %221 = arith.truncf %220 : vector<8x128xf32> to vector<8x128xbf16>
    %222 = arith.index_cast %183 : i32 to index
    %c0_79 = arith.constant 0 : index
    %c0_80 = arith.constant 0 : index
    %223 = vector.load %arg4[%222, %c0_79, %c0_80] : memref<8x8x128xbf16, #tpu.memory_space<vmem>>, vector<1x8x128xbf16>
    %224 = vector.shape_cast %223 : vector<1x8x128xbf16> to vector<8x128xbf16>
    %225 = vector.shape_cast %221 : vector<8x128xbf16> to vector<1x8x128xbf16>
    tpu.vector_store %arg4[%222, %c0_79, %c0_80], %225 {strides = array<i32>} : memref<8x8x128xbf16, #tpu.memory_space<vmem>>, vector<1x8x128xbf16>,
    %c5_i32 = arith.constant 5 : i32
    %c8_i32_81 = arith.constant 8 : i32
    %226 = arith.muli %c0_i32_6, %c8_i32_81 : i32
    %227 = arith.addi %226, %c5_i32 : i32
    %cst_82 = arith.constant dense<0.000000e+00> : vector<8x512xf32>
    %228 = tpu.matmul %221, %3, %cst_82 {dimension_numbers = #tpu.dot_dimension_numbers<[1], [0], [0], [1], [0, 0, 1, 1], [], []>} : vector<8x128xbf16>, vector<128x512xbf16>, vector<8x512xf32> -> vector<8x512xf32>
    %229 = arith.index_cast %227 : i32 to index
    %c0_83 = arith.constant 0 : index
    %c0_84 = arith.constant 0 : index
    %230 = vector.load %arg2[%229, %c0_83, %c0_84] : memref<8x8x512xbf16, #tpu.memory_space<vmem>>, vector<1x8x512xbf16>
    %231 = vector.shape_cast %230 : vector<1x8x512xbf16> to vector<8x512xbf16>
    %232 = arith.extf %231 : vector<8x512xbf16> to vector<8x512xf32>
    %233 = arith.addf %228, %232 : vector<8x512xf32>
    %234 = vector.extract_strided_slice %233 {offsets = [0, 0], sizes = [8, 128], strides = [1, 1]} : vector<8x512xf32> to vector<8x128xf32>
    %cst_85 = arith.constant 5.000000e-01 : f32
    %235 = vector.broadcast %cst_85 : f32 to vector<8x128xf32>
    %236 = arith.mulf %235, %234 : vector<8x128xf32>
    %237 = math.tanh %236 : vector<8x128xf32>
    %cst_86 = arith.constant 5.000000e-01 : f32
    %238 = vector.broadcast %cst_86 : f32 to vector<8x128xf32>
    %239 = arith.mulf %238, %237 : vector<8x128xf32>
    %cst_87 = arith.constant 5.000000e-01 : f32
    %240 = vector.broadcast %cst_87 : f32 to vector<8x128xf32>
    %241 = arith.addf %239, %240 : vector<8x128xf32>
    %242 = vector.extract_strided_slice %233 {offsets = [0, 128], sizes = [8, 128], strides = [1, 1]} : vector<8x512xf32> to vector<8x128xf32>
    %cst_88 = arith.constant 5.000000e-01 : f32
    %243 = vector.broadcast %cst_88 : f32 to vector<8x128xf32>
    %244 = arith.mulf %243, %242 : vector<8x128xf32>
    %245 = math.tanh %244 : vector<8x128xf32>
    %cst_89 = arith.constant 5.000000e-01 : f32
    %246 = vector.broadcast %cst_89 : f32 to vector<8x128xf32>
    %247 = arith.mulf %246, %245 : vector<8x128xf32>
    %cst_90 = arith.constant 5.000000e-01 : f32
    %248 = vector.broadcast %cst_90 : f32 to vector<8x128xf32>
    %249 = arith.addf %247, %248 : vector<8x128xf32>
    %250 = vector.extract_strided_slice %233 {offsets = [0, 256], sizes = [8, 128], strides = [1, 1]} : vector<8x512xf32> to vector<8x128xf32>
    %251 = math.tanh %250 : vector<8x128xf32>
    %252 = vector.extract_strided_slice %233 {offsets = [0, 384], sizes = [8, 128], strides = [1, 1]} : vector<8x512xf32> to vector<8x128xf32>
    %cst_91 = arith.constant 5.000000e-01 : f32
    %253 = vector.broadcast %cst_91 : f32 to vector<8x128xf32>
    %254 = arith.mulf %253, %252 : vector<8x128xf32>
    %255 = math.tanh %254 : vector<8x128xf32>
    %cst_92 = arith.constant 5.000000e-01 : f32
    %256 = vector.broadcast %cst_92 : f32 to vector<8x128xf32>
    %257 = arith.mulf %256, %255 : vector<8x128xf32>
    %cst_93 = arith.constant 5.000000e-01 : f32
    %258 = vector.broadcast %cst_93 : f32 to vector<8x128xf32>
    %259 = arith.addf %257, %258 : vector<8x128xf32>
    %260 = arith.mulf %249, %218 : vector<8x128xf32>
    %261 = arith.mulf %241, %251 : vector<8x128xf32>
    %262 = arith.addf %260, %261 : vector<8x128xf32>
    %263 = math.tanh %262 : vector<8x128xf32>
    %264 = arith.mulf %259, %263 : vector<8x128xf32>
    %265 = arith.truncf %264 : vector<8x128xf32> to vector<8x128xbf16>
    %266 = arith.index_cast %227 : i32 to index
    %c0_94 = arith.constant 0 : index
    %c0_95 = arith.constant 0 : index
    %267 = vector.load %arg4[%266, %c0_94, %c0_95] : memref<8x8x128xbf16, #tpu.memory_space<vmem>>, vector<1x8x128xbf16>
    %268 = vector.shape_cast %267 : vector<1x8x128xbf16> to vector<8x128xbf16>
    %269 = vector.shape_cast %265 : vector<8x128xbf16> to vector<1x8x128xbf16>
    tpu.vector_store %arg4[%266, %c0_94, %c0_95], %269 {strides = array<i32>} : memref<8x8x128xbf16, #tpu.memory_space<vmem>>, vector<1x8x128xbf16>,
    %c6_i32 = arith.constant 6 : i32
    %c8_i32_96 = arith.constant 8 : i32
    %270 = arith.muli %c0_i32_6, %c8_i32_96 : i32
    %271 = arith.addi %270, %c6_i32 : i32
    %cst_97 = arith.constant dense<0.000000e+00> : vector<8x512xf32>
    %272 = tpu.matmul %265, %3, %cst_97 {dimension_numbers = #tpu.dot_dimension_numbers<[1], [0], [0], [1], [0, 0, 1, 1], [], []>} : vector<8x128xbf16>, vector<128x512xbf16>, vector<8x512xf32> -> vector<8x512xf32>
    %273 = arith.index_cast %271 : i32 to index
    %c0_98 = arith.constant 0 : index
    %c0_99 = arith.constant 0 : index
    %274 = vector.load %arg2[%273, %c0_98, %c0_99] : memref<8x8x512xbf16, #tpu.memory_space<vmem>>, vector<1x8x512xbf16>
    %275 = vector.shape_cast %274 : vector<1x8x512xbf16> to vector<8x512xbf16>
    %276 = arith.extf %275 : vector<8x512xbf16> to vector<8x512xf32>
    %277 = arith.addf %272, %276 : vector<8x512xf32>
    %278 = vector.extract_strided_slice %277 {offsets = [0, 0], sizes = [8, 128], strides = [1, 1]} : vector<8x512xf32> to vector<8x128xf32>
    %cst_100 = arith.constant 5.000000e-01 : f32
    %279 = vector.broadcast %cst_100 : f32 to vector<8x128xf32>
    %280 = arith.mulf %279, %278 : vector<8x128xf32>
    %281 = math.tanh %280 : vector<8x128xf32>
    %cst_101 = arith.constant 5.000000e-01 : f32
    %282 = vector.broadcast %cst_101 : f32 to vector<8x128xf32>
    %283 = arith.mulf %282, %281 : vector<8x128xf32>
    %cst_102 = arith.constant 5.000000e-01 : f32
    %284 = vector.broadcast %cst_102 : f32 to vector<8x128xf32>
    %285 = arith.addf %283, %284 : vector<8x128xf32>
    %286 = vector.extract_strided_slice %277 {offsets = [0, 128], sizes = [8, 128], strides = [1, 1]} : vector<8x512xf32> to vector<8x128xf32>
    %cst_103 = arith.constant 5.000000e-01 : f32
    %287 = vector.broadcast %cst_103 : f32 to vector<8x128xf32>
    %288 = arith.mulf %287, %286 : vector<8x128xf32>
    %289 = math.tanh %288 : vector<8x128xf32>
    %cst_104 = arith.constant 5.000000e-01 : f32
    %290 = vector.broadcast %cst_104 : f32 to vector<8x128xf32>
    %291 = arith.mulf %290, %289 : vector<8x128xf32>
    %cst_105 = arith.constant 5.000000e-01 : f32
    %292 = vector.broadcast %cst_105 : f32 to vector<8x128xf32>
    %293 = arith.addf %291, %292 : vector<8x128xf32>
    %294 = vector.extract_strided_slice %277 {offsets = [0, 256], sizes = [8, 128], strides = [1, 1]} : vector<8x512xf32> to vector<8x128xf32>
    %295 = math.tanh %294 : vector<8x128xf32>
    %296 = vector.extract_strided_slice %277 {offsets = [0, 384], sizes = [8, 128], strides = [1, 1]} : vector<8x512xf32> to vector<8x128xf32>
    %cst_106 = arith.constant 5.000000e-01 : f32
    %297 = vector.broadcast %cst_106 : f32 to vector<8x128xf32>
    %298 = arith.mulf %297, %296 : vector<8x128xf32>
    %299 = math.tanh %298 : vector<8x128xf32>
    %cst_107 = arith.constant 5.000000e-01 : f32
    %300 = vector.broadcast %cst_107 : f32 to vector<8x128xf32>
    %301 = arith.mulf %300, %299 : vector<8x128xf32>
    %cst_108 = arith.constant 5.000000e-01 : f32
    %302 = vector.broadcast %cst_108 : f32 to vector<8x128xf32>
    %303 = arith.addf %301, %302 : vector<8x128xf32>
    %304 = arith.mulf %293, %262 : vector<8x128xf32>
    %305 = arith.mulf %285, %295 : vector<8x128xf32>
    %306 = arith.addf %304, %305 : vector<8x128xf32>
    %307 = math.tanh %306 : vector<8x128xf32>
    %308 = arith.mulf %303, %307 : vector<8x128xf32>
    %309 = arith.truncf %308 : vector<8x128xf32> to vector<8x128xbf16>
    %310 = arith.index_cast %271 : i32 to index
    %c0_109 = arith.constant 0 : index
    %c0_110 = arith.constant 0 : index
    %311 = vector.load %arg4[%310, %c0_109, %c0_110] : memref<8x8x128xbf16, #tpu.memory_space<vmem>>, vector<1x8x128xbf16>
    %312 = vector.shape_cast %311 : vector<1x8x128xbf16> to vector<8x128xbf16>
    %313 = vector.shape_cast %309 : vector<8x128xbf16> to vector<1x8x128xbf16>
    tpu.vector_store %arg4[%310, %c0_109, %c0_110], %313 {strides = array<i32>} : memref<8x8x128xbf16, #tpu.memory_space<vmem>>, vector<1x8x128xbf16>,
    %c7_i32 = arith.constant 7 : i32
    %c8_i32_111 = arith.constant 8 : i32
    %314 = arith.muli %c0_i32_6, %c8_i32_111 : i32
    %315 = arith.addi %314, %c7_i32 : i32
    %cst_112 = arith.constant dense<0.000000e+00> : vector<8x512xf32>
    %316 = tpu.matmul %309, %3, %cst_112 {dimension_numbers = #tpu.dot_dimension_numbers<[1], [0], [0], [1], [0, 0, 1, 1], [], []>} : vector<8x128xbf16>, vector<128x512xbf16>, vector<8x512xf32> -> vector<8x512xf32>
    %317 = arith.index_cast %315 : i32 to index
    %c0_113 = arith.constant 0 : index
    %c0_114 = arith.constant 0 : index
    %318 = vector.load %arg2[%317, %c0_113, %c0_114] : memref<8x8x512xbf16, #tpu.memory_space<vmem>>, vector<1x8x512xbf16>
    %319 = vector.shape_cast %318 : vector<1x8x512xbf16> to vector<8x512xbf16>
    %320 = arith.extf %319 : vector<8x512xbf16> to vector<8x512xf32>
    %321 = arith.addf %316, %320 : vector<8x512xf32>
    %322 = vector.extract_strided_slice %321 {offsets = [0, 0], sizes = [8, 128], strides = [1, 1]} : vector<8x512xf32> to vector<8x128xf32>
    %cst_115 = arith.constant 5.000000e-01 : f32
    %323 = vector.broadcast %cst_115 : f32 to vector<8x128xf32>
    %324 = arith.mulf %323, %322 : vector<8x128xf32>
    %325 = math.tanh %324 : vector<8x128xf32>
    %cst_116 = arith.constant 5.000000e-01 : f32
    %326 = vector.broadcast %cst_116 : f32 to vector<8x128xf32>
    %327 = arith.mulf %326, %325 : vector<8x128xf32>
    %cst_117 = arith.constant 5.000000e-01 : f32
    %328 = vector.broadcast %cst_117 : f32 to vector<8x128xf32>
    %329 = arith.addf %327, %328 : vector<8x128xf32>
    %330 = vector.extract_strided_slice %321 {offsets = [0, 128], sizes = [8, 128], strides = [1, 1]} : vector<8x512xf32> to vector<8x128xf32>
    %cst_118 = arith.constant 5.000000e-01 : f32
    %331 = vector.broadcast %cst_118 : f32 to vector<8x128xf32>
    %332 = arith.mulf %331, %330 : vector<8x128xf32>
    %333 = math.tanh %332 : vector<8x128xf32>
    %cst_119 = arith.constant 5.000000e-01 : f32
    %334 = vector.broadcast %cst_119 : f32 to vector<8x128xf32>
    %335 = arith.mulf %334, %333 : vector<8x128xf32>
    %cst_120 = arith.constant 5.000000e-01 : f32
    %336 = vector.broadcast %cst_120 : f32 to vector<8x128xf32>
    %337 = arith.addf %335, %336 : vector<8x128xf32>
    %338 = vector.extract_strided_slice %321 {offsets = [0, 256], sizes = [8, 128], strides = [1, 1]} : vector<8x512xf32> to vector<8x128xf32>
    %339 = math.tanh %338 : vector<8x128xf32>
    %340 = vector.extract_strided_slice %321 {offsets = [0, 384], sizes = [8, 128], strides = [1, 1]} : vector<8x512xf32> to vector<8x128xf32>
    %cst_121 = arith.constant 5.000000e-01 : f32
    %341 = vector.broadcast %cst_121 : f32 to vector<8x128xf32>
    %342 = arith.mulf %341, %340 : vector<8x128xf32>
    %343 = math.tanh %342 : vector<8x128xf32>
    %cst_122 = arith.constant 5.000000e-01 : f32
    %344 = vector.broadcast %cst_122 : f32 to vector<8x128xf32>
    %345 = arith.mulf %344, %343 : vector<8x128xf32>
    %cst_123 = arith.constant 5.000000e-01 : f32
    %346 = vector.broadcast %cst_123 : f32 to vector<8x128xf32>
    %347 = arith.addf %345, %346 : vector<8x128xf32>
    %348 = arith.mulf %337, %306 : vector<8x128xf32>
    %349 = arith.mulf %329, %339 : vector<8x128xf32>
    %350 = arith.addf %348, %349 : vector<8x128xf32>
    %351 = math.tanh %350 : vector<8x128xf32>
    %352 = arith.mulf %347, %351 : vector<8x128xf32>
    %353 = arith.truncf %352 : vector<8x128xf32> to vector<8x128xbf16>
    %354 = arith.index_cast %315 : i32 to index
    %c0_124 = arith.constant 0 : index
    %c0_125 = arith.constant 0 : index
    %355 = vector.load %arg4[%354, %c0_124, %c0_125] : memref<8x8x128xbf16, #tpu.memory_space<vmem>>, vector<1x8x128xbf16>
    %356 = vector.shape_cast %355 : vector<1x8x128xbf16> to vector<8x128xbf16>
    %357 = vector.shape_cast %353 : vector<8x128xbf16> to vector<1x8x128xbf16>
    tpu.vector_store %arg4[%354, %c0_124, %c0_125], %357 {strides = array<i32>} : memref<8x8x128xbf16, #tpu.memory_space<vmem>>, vector<1x8x128xbf16>,
    %c8_i32_126 = arith.constant 8 : i32
    %c1_i32_127 = arith.constant 1 : i32
    %c0_128 = arith.constant 0 : index
    %c0_129 = arith.constant 0 : index
    %358 = vector.load %arg5[%c0_128, %c0_129] : memref<8x128xbf16, #tpu.memory_space<vmem>>, vector<8x128xbf16>
    tpu.vector_store %arg5[%c0_128, %c0_129], %353 {strides = array<i32>} : memref<8x128xbf16, #tpu.memory_space<vmem>>, vector<8x128xbf16>,
    %c0_130 = arith.constant 0 : index
    %c0_131 = arith.constant 0 : index
    %359 = vector.load %arg6[%c0_130, %c0_131] : memref<8x128xf32, #tpu.memory_space<vmem>>, vector<8x128xf32>
    tpu.vector_store %arg6[%c0_130, %c0_131], %350 {strides = array<i32>} : memref<8x128xf32, #tpu.memory_space<vmem>>, vector<8x128xf32>,
    return
  }
  func.func @transform_0(%arg0: i32, %arg1: i32) -> (i32, i32, i32) {
    %c0_i32 = arith.constant 0 : i32
    %c0_i32_0 = arith.constant 0 : i32
    return %arg1, %arg0, %c0_i32 : i32, i32, i32
  }
  func.func @transform_1(%arg0: i32, %arg1: i32) -> (i32, i32) {
    %c0_i32 = arith.constant 0 : i32
    %c0_i32_0 = arith.constant 0 : i32
    %c0_i32_1 = arith.constant 0 : i32
    return %c0_i32, %c0_i32_0 : i32, i32
  }
  func.func @transform_2(%arg0: i32, %arg1: i32) -> (i32, i32, i32) {
    %c0_i32 = arith.constant 0 : i32
    %c0_i32_0 = arith.constant 0 : i32
    return %arg1, %arg0, %c0_i32 : i32, i32, i32
  }
}

module attributes {stable_mosaic.version = 11 : i64} {
  func.func @proj_kernel(%arg0: i32, %arg1: i32, %arg2: memref<64x128xbf16, #tpu.memory_space<vmem>>, %arg3: memref<128x128xbf16, #tpu.memory_space<vmem>>, %arg4: memref<1x128xf32, #tpu.memory_space<vmem>>, %arg5: memref<64x128xbf16, #tpu.memory_space<vmem>>) attributes {dimension_semantics = [#tpu.dimension_semantics<parallel>, #tpu.dimension_semantics<arbitrary>], iteration_bounds = array<i64: 1, 1>, scalar_prefetch = 0 : i64, scratch_operands = 0 : i64, tpu.core_type = #tpu.core_type<tc>, window_params = [{transform_indices = @transform_0, window_bounds = array<i64: 64, 128>}, {transform_indices = @transform_1, window_bounds = array<i64: 128, 128>}, {transform_indices = @transform_2, window_bounds = array<i64: 1, 128>}, {transform_indices = @transform_3, window_bounds = array<i64: 64, 128>}]} {
    %c0 = arith.constant 0 : index
    %c0_0 = arith.constant 0 : index
    %0 = vector.load %arg2[%c0, %c0_0] : memref<64x128xbf16, #tpu.memory_space<vmem>>, vector<64x128xbf16>
    %c0_1 = arith.constant 0 : index
    %c0_2 = arith.constant 0 : index
    %1 = vector.load %arg3[%c0_1, %c0_2] : memref<128x128xbf16, #tpu.memory_space<vmem>>, vector<128x128xbf16>
    %cst = arith.constant dense<0.000000e+00> : vector<64x128xf32>
    %2 = tpu.matmul %0, %1, %cst {dimension_numbers = #tpu.dot_dimension_numbers<[1], [0], [0], [1], [0, 0, 1, 1], [], []>} : vector<64x128xbf16>, vector<128x128xbf16>, vector<64x128xf32> -> vector<64x128xf32>
    %c0_3 = arith.constant 0 : index
    %c0_4 = arith.constant 0 : index
    %3 = vector.load %arg4[%c0_3, %c0_4] : memref<1x128xf32, #tpu.memory_space<vmem>>, vector<1x128xf32>
    %4 = vector.broadcast %3 : vector<1x128xf32> to vector<64x128xf32>
    %5 = arith.addf %2, %4 : vector<64x128xf32>
    %6 = arith.truncf %5 : vector<64x128xf32> to vector<64x128xbf16>
    %c0_5 = arith.constant 0 : index
    %c0_6 = arith.constant 0 : index
    %7 = vector.load %arg5[%c0_5, %c0_6] : memref<64x128xbf16, #tpu.memory_space<vmem>>, vector<64x128xbf16>
    tpu.vector_store %arg5[%c0_5, %c0_6], %6 {strides = array<i32>} : memref<64x128xbf16, #tpu.memory_space<vmem>>, vector<64x128xbf16>,
    return
  }
  func.func @transform_0(%arg0: i32, %arg1: i32) -> (i32, i32) {
    %c0_i32 = arith.constant 0 : i32
    %c0_i32_0 = arith.constant 0 : i32
    return %arg1, %c0_i32 : i32, i32
  }
  func.func @transform_1(%arg0: i32, %arg1: i32) -> (i32, i32) {
    %c0_i32 = arith.constant 0 : i32
    %c0_i32_0 = arith.constant 0 : i32
    return %c0_i32, %arg0 : i32, i32
  }
  func.func @transform_2(%arg0: i32, %arg1: i32) -> (i32, i32) {
    %c0_i32 = arith.constant 0 : i32
    %c0_i32_0 = arith.constant 0 : i32
    return %c0_i32, %arg0 : i32, i32
  }
  func.func @transform_3(%arg0: i32, %arg1: i32) -> (i32, i32) {
    %c0_i32 = arith.constant 0 : i32
    return %arg1, %arg0 : i32, i32
  }
}

</mosaic_0001>

<bundles_post_ra>
// kernel: lm_forward.5
= control target key start
LH: loop header
LB: loop body
LE: loop exit
PB: predicated region body
PF: predicated region fallthrough
CT: control target
= control target key end

     0   :  { %s414_s1 = inlined_call_operand.vmem [shape: bf16[128,128], index: 1, kind: input, shape index: {}]   ;;  %s415_s0 = inlined_call_operand.vmem [shape: bf16[64,128], index: 0, kind: input, shape index: {}]   ;;  %s416_s2 = inlined_call_operand.vmem [shape: f32[1,128], index: 2, kind: input, shape index: {}]   ;;  %s417_s3 = inlined_call_operand.vmem [shape: bf16[64,128], index: 3, kind: output, shape index: {}]  }
   0x1   :  { %v331_v0 = vld [vmem:[%s414_s1 + $0x38] sm:$0xff]   ;;  %v332_v1 = vld [vmem:[%s414_s1 + $0x30] sm:$0xff]   ;;  %v333_v2 = vld [vmem:[%s414_s1 + $0x28] sm:$0xff]  }
   0x2   :  { %291 = vmatprep.subr.bf16.mxu0 %v331_v0  ;;  %315 = vmatprep.subr.bf16.mxu1 %v331_v0  ;;  %v334_v3 = vld [vmem:[%s414_s1 + $0x20] sm:$0xff]   ;;  %v340_v5 = vld [vmem:[%s415_s0 + $0x10] sm:$0xff]   ;;  %v335_v6 = vld [vmem:[%s414_s1 + $0x18] sm:$0xff]  }
   0x3   :  { %292 = vmatpush3.bf16.msra.mxu0 %v331_v0  ;;  %323 = vmatpush3.bf16.msra.mxu1 %v331_v0  ;;  %v339_v4 = vld [vmem:[%s415_s0] sm:$0xff]   ;;  %v336_v7 = vld [vmem:[%s414_s1 + $0x10] sm:$0xff]   ;;  %v337_v8 = vld [vmem:[%s414_s1 + $0x8] sm:$0xff]  }
   0x4   :  { %293 = vmatprep.subr.bf16.mxu0 %v332_v1  ;;  %316 = vmatprep.subr.bf16.mxu1 %v332_v1  ;;  %v338_v9 = vld [vmem:[%s414_s1] sm:$0xff]   ;;  %v341_v10 = vld [vmem:[%s415_s0 + $0x8] sm:$0xff]   ;;  %v342_v11 = vld [vmem:[%s415_s0 + $0x18] sm:$0xff]  }
   0x5   :  { %307 = vmatprep.mubr.bf16.mxu0 %v339_v4  ;;  %311 = vmatprep.mubr.bf16.mxu1 %v340_v5  ;;  %v227_v14 = vld [vmem:[%s416_s2] ss:$0 sm:$0xff] }
   0x7   :  { %294 = vmatpush3.bf16.msra.mxu0 %v332_v1  ;;  %324 = vmatpush3.bf16.msra.mxu1 %v332_v1 }
   0x8   :  { %295 = vmatprep.subr.bf16.mxu0 %v333_v2  ;;  %317 = vmatprep.subr.bf16.mxu1 %v333_v2 }
   0xb   :  { %296 = vmatpush3.bf16.msra.mxu0 %v333_v2  ;;  %325 = vmatpush3.bf16.msra.mxu1 %v333_v2 }
   0xc   :  { %297 = vmatprep.subr.bf16.mxu0 %v334_v3  ;;  %318 = vmatprep.subr.bf16.mxu1 %v334_v3 }
   0xf   :  { %298 = vmatpush3.bf16.msra.mxu0 %v334_v3  ;;  %326 = vmatpush3.bf16.msra.mxu1 %v334_v3 }
  0x10   :  { %299 = vmatprep.subr.bf16.mxu0 %v335_v6  ;;  %319 = vmatprep.subr.bf16.mxu1 %v335_v6 }
  0x13   :  { %300 = vmatpush3.bf16.msra.mxu0 %v335_v6  ;;  %327 = vmatpush3.bf16.msra.mxu1 %v335_v6 }
  0x14   :  { %301 = vmatprep.subr.bf16.mxu0 %v336_v7  ;;  %320 = vmatprep.subr.bf16.mxu1 %v336_v7 }
  0x17   :  { %302 = vmatpush3.bf16.msra.mxu0 %v336_v7  ;;  %328 = vmatpush3.bf16.msra.mxu1 %v336_v7 }
  0x18   :  { %303 = vmatprep.subr.bf16.mxu0 %v337_v8  ;;  %321 = vmatprep.subr.bf16.mxu1 %v337_v8 }
  0x1b   :  { %304 = vmatpush3.bf16.msra.mxu0 %v337_v8  ;;  %329 = vmatpush3.bf16.msra.mxu1 %v337_v8 }
  0x1c   :  { %305 = vmatprep.subr.bf16.mxu0 %v338_v9  ;;  %322 = vmatprep.subr.bf16.mxu1 %v338_v9 }
  0x1f   :  { %306 = vmatpush3.bf16.msra.mxu0 %v338_v9  ;;  %330 = vmatpush3.bf16.msra.mxu1 %v338_v9 }
  0x22   :  { %308 = vmatmul.mubr.bf16.vlgmr.msra.gmra.mxu0 %v341_v10  ;;  %312 = vmatmul.mubr.bf16.vlgmr.msra.gmra.mxu1 %v342_v11 }
  0xe2   :  { %v309_v12 = vpop.f32.mrf.mxu0  ;;  %v313_v13 = vpop.f32.mrf.mxu1 }
  0xe3   :  { %v161_v19 = vadd.f32 %v309_v12, %v227_v14  ;;  %v177_v20 = vadd.f32 %v313_v13, %v227_v14 }
  0xe4   :  { %v152_v15 = vpop.f32.mrf.mxu0  ;;  %v168_v16 = vpop.f32.mrf.mxu1 }
  0xe5   :  { %v153_v23 = vadd.f32 %v227_v14, %v152_v15  ;;  %v169_v24 = vadd.f32 %v227_v14, %v168_v16 }
  0xe6   :  { %v310_v17 = vpop.f32.mrf.mxu0  ;;  %v314_v18 = vpop.f32.mrf.mxu1 }
  0xe7   :  { %v164_v21 = vadd.f32 %v310_v17, %v227_v14  ;;  %v180_v22 = vadd.f32 %v314_v18, %v227_v14 }
  0xe8   :  { %v155_v25 = vpop.f32.mrf.mxu0  ;;  %v171_v26 = vpop.f32.mrf.mxu1 }
  0xe9   :  { %v264_v27 = vpack.c.bf16 %v164_v21, %v161_v19  ;;  %v274_v28 = vpack.c.bf16 %v180_v22, %v177_v20  ;;  %v156_v29 = vadd.f32 %v227_v14, %v155_v25  ;;  %v172_v30 = vadd.f32 %v227_v14, %v171_v26 }
  0xeb   :  { %276 = vst [vmem:[%s417_s3 + $0x8] sm:$0xff] %v264_v27   ;;  %278 = vst [vmem:[%s417_s3 + $0x18] sm:$0xff] %v274_v28   ;;  %v259_v31 = vpack.c.bf16 %v156_v29, %v153_v23  ;;  %v269_v32 = vpack.c.bf16 %v172_v30, %v169_v24 }
  0xed   :  { %260 = vst [vmem:[%s417_s3] sm:$0xff] %v259_v31   ;;  %277 = vst [vmem:[%s417_s3 + $0x10] sm:$0xff] %v269_v32  }

// kernel: lm_forward.3
= control target key start
LH: loop header
LB: loop body
LE: loop exit
PB: predicated region body
PF: predicated region fallthrough
CT: control target
= control target key end

     0   :  { %v1310_v1 = vmov 0   ;;  %s1919_s1 = inlined_call_operand.vmem [shape: bf16[128,512], index: 1, kind: input, shape index: {}]   ;;  %s1920_s0 = inlined_call_operand.vmem [shape: bf16[8,8,512], index: 0, kind: input, shape index: {}]   ;;  %s1921_s2 = inlined_call_operand.vmem [shape: bf16[8,8,128], index: 2, kind: output, shape index: {}]  }
   0x1   :  { %v1329_v0 = vld [vmem:[%s1919_s1 + $0xe4] ss:$16 sps:$4 sm:$0xff]   ;;  %250 = vmatprep.mubr.bf16.mxu0 %v1310_v1  ;;  %16 = vst [vmem:[#allocation2] sm:$0xf] %v1310_v1  ;;  %291 = vmatprep.mubr.bf16.mxu1 %v1310_v1  ;;  %v1337_v2 = vld [vmem:[%s1919_s1 + $0xe0] ss:$16 sps:$4 sm:$0xff]  }
   0x2   :  { %218 = vmatprep.subr.bf16.mxu0 %v1329_v0  ;;  %v1343_v3 = vld [vmem:[%s1919_s1 + $0xec] ss:$16 sps:$4 sm:$0xff]   ;;  %v1348_v4 = vld [vmem:[%s1919_s1 + $0xe8] ss:$16 sps:$4 sm:$0xff]   ;;  %v1354_v5 = vld [vmem:[%s1919_s1 + $0xc4] ss:$16 sps:$4 sm:$0xff]  }
   0x3   :  { %219 = vmatpush1.bf16.msra.mxu0 %v1337_v2  ;;  %v1359_v6 = vld [vmem:[%s1919_s1 + $0xc0] ss:$16 sps:$4 sm:$0xff]   ;;  %259 = vmatprep.subr.bf16.mxu1 %v1343_v3  ;;  %v1365_v7 = vld [vmem:[%s1919_s1 + $0xcc] ss:$16 sps:$4 sm:$0xff]   ;;  %v1372_v8 = vld [vmem:[%s1919_s1 + $0xc8] ss:$16 sps:$4 sm:$0xff]  }
   0x4   :  { %260 = vmatpush1.bf16.msra.mxu1 %v1348_v4  ;;  %220 = vmatprep.subr.bf16.mxu0 %v1354_v5  ;;  %v1378_v9 = vld [vmem:[%s1919_s1 + $0xa4] ss:$16 sps:$4 sm:$0xff]   ;;  %v1384_v10 = vld [vmem:[%s1919_s1 + $0xa0] ss:$16 sps:$4 sm:$0xff]   ;;  %v1389_v11 = vld [vmem:[%s1919_s1 + $0xac] ss:$16 sps:$4 sm:$0xff]  }
   0x5   :  { %261 = vmatprep.subr.bf16.mxu1 %v1365_v7  ;;  %v1395_v12 = vld [vmem:[%s1919_s1 + $0x84] ss:$16 sps:$4 sm:$0xff]   ;;  %v1401_v13 = vld [vmem:[%s1919_s1 + $0xa8] ss:$16 sps:$4 sm:$0xff]   ;;  %v1407_v14 = vld [vmem:[%s1919_s1 + $0x8c] ss:$16 sps:$4 sm:$0xff]  }
   0x6   :  { %v1413_v15 = vld [vmem:[%s1919_s1 + $0x80] ss:$16 sps:$4 sm:$0xff]   ;;  %v1419_v16 = vld [vmem:[%s1919_s1 + $0x64] ss:$16 sps:$4 sm:$0xff]   ;;  %v1425_v17 = vld [vmem:[%s1919_s1 + $0x88] ss:$16 sps:$4 sm:$0xff]  }
   0x7   :  { %221 = vmatpush1.bf16.msra.mxu0 %v1359_v6  ;;  %v1431_v18 = vld [vmem:[%s1919_s1 + $0x6c] ss:$16 sps:$4 sm:$0xff]   ;;  %v1437_v19 = vld [vmem:[%s1919_s1 + $0x60] ss:$16 sps:$4 sm:$0xff]   ;;  %v1443_v20 = vld [vmem:[%s1919_s1 + $0x44] ss:$16 sps:$4 sm:$0xff]  }
   0x8   :  { %222 = vmatprep.subr.bf16.mxu0 %v1378_v9  ;;  %262 = vmatpush1.bf16.msra.mxu1 %v1372_v8  ;;  %v1449_v21 = vld [vmem:[%s1919_s1 + $0x68] ss:$16 sps:$4 sm:$0xff]   ;;  %v1455_v22 = vld [vmem:[%s1919_s1 + $0x4c] ss:$16 sps:$4 sm:$0xff]   ;;  %v1461_v23 = vld [vmem:[%s1919_s1 + $0x40] ss:$16 sps:$4 sm:$0xff]  }
   0x9   :  { %263 = vmatprep.subr.bf16.mxu1 %v1389_v11  ;;  %v1467_v24 = vld [vmem:[%s1919_s1 + $0x24] ss:$16 sps:$4 sm:$0xff]   ;;  %v1473_v25 = vld [vmem:[%s1919_s1 + $0x48] ss:$16 sps:$4 sm:$0xff]   ;;  %v1479_v26 = vld [vmem:[%s1919_s1 + $0x2c] ss:$16 sps:$4 sm:$0xff]  }
   0xa   :  { %v1485_v27 = vld [vmem:[%s1919_s1 + $0x20] ss:$16 sps:$4 sm:$0xff]   ;;  %v1491_v28 = vld [vmem:[%s1919_s1 + $0x4] ss:$16 sps:$4 sm:$0xff]   ;;  %v1497_v29 = vld [vmem:[%s1919_s1 + $0x28] ss:$16 sps:$4 sm:$0xff]  }
   0xb   :  { %223 = vmatpush1.bf16.msra.mxu0 %v1384_v10  ;;  %v1503_v30 = vld [vmem:[%s1919_s1 + $0xc] ss:$16 sps:$4 sm:$0xff]   ;;  %v1509_v31 = vld [vmem:[%s1919_s1] ss:$16 sps:$4 sm:$0xff]   ;;  %v1516_v32 = vld [vmem:[%s1919_s1 + $0x8] ss:$16 sps:$4 sm:$0xff]  }
   0xc   :  { %224 = vmatprep.subr.bf16.mxu0 %v1395_v12  ;;  %264 = vmatpush1.bf16.msra.mxu1 %v1401_v13  ;;  %v50_v33 = vld [vmem:[#allocation2] sm:$0xf]  ;;  %v53_v36 = vld [vmem:[%s1920_s0 + $0x8] sm:$0xff] }
   0xd   :  { %265 = vmatprep.subr.bf16.mxu1 %v1407_v14  ;;  %v52_v34 = vld [vmem:[%s1920_s0] sm:$0xff]  ;;  %v56_v40 = vunpack.c.l.bf16 %v53_v36  ;;  %v57_v52 = vunpack.c.h.bf16 %v53_v36 }
   0xe   :  { %v54_v35 = vunpack.c.l.bf16 %v52_v34  ;;  %v55_v37 = vunpack.c.h.bf16 %v52_v34 }
   0xf   :  { %225 = vmatpush1.bf16.msra.mxu0 %v1413_v15 }
  0x10   :  { %226 = vmatprep.subr.bf16.mxu0 %v1419_v16  ;;  %266 = vmatpush1.bf16.msra.mxu1 %v1425_v17 }
  0x11   :  { %267 = vmatprep.subr.bf16.mxu1 %v1431_v18 }
  0x13   :  { %227 = vmatpush1.bf16.msra.mxu0 %v1437_v19 }
  0x14   :  { %228 = vmatprep.subr.bf16.mxu0 %v1443_v20  ;;  %268 = vmatpush1.bf16.msra.mxu1 %v1449_v21 }
  0x15   :  { %269 = vmatprep.subr.bf16.mxu1 %v1455_v22 }
  0x17   :  { %229 = vmatpush1.bf16.msra.mxu0 %v1461_v23 }
  0x18   :  { %230 = vmatprep.subr.bf16.mxu0 %v1467_v24  ;;  %270 = vmatpush1.bf16.msra.mxu1 %v1473_v25 }
  0x19   :  { %271 = vmatprep.subr.bf16.mxu1 %v1479_v26 }
  0x1b   :  { %231 = vmatpush1.bf16.msra.mxu0 %v1485_v27 }
  0x1c   :  { %232 = vmatprep.subr.bf16.mxu0 %v1491_v28  ;;  %272 = vmatpush1.bf16.msra.mxu1 %v1497_v29 }
  0x1d   :  { %273 = vmatprep.subr.bf16.mxu1 %v1503_v30 }
  0x1f   :  { %233 = vmatpush1.bf16.msra.mxu0 %v1509_v31 }
  0x20   :  { %327 = vmatprep.subr.bf16.mxu0 %v1329_v0  ;;  %274 = vmatpush1.bf16.msra.mxu1 %v1516_v32 }
  0x21   :  { %368 = vmatprep.subr.bf16.mxu1 %v1343_v3 }
  0x22   :  { %251 = vmatmul.mubr.bf16.vlgmr.msra.gmra.mxu0 %v50_v33 }
  0x23   :  { %328 = vmatpush1.bf16.msra.mxu0 %v1337_v2  ;;  %359 = vmatprep.mubr.bf16.mxu0 %v1310_v1 }
  0x24   :  { %292 = vmatmul.mubr.bf16.vlgmr.msra.gmra.mxu1 %v50_v33  ;;  %329 = vmatprep.subr.bf16.mxu0 %v1354_v5 }
  0x25   :  { %369 = vmatpush1.bf16.msra.mxu1 %v1348_v4  ;;  %400 = vmatprep.mubr.bf16.mxu1 %v1310_v1 }
  0x26   :  { %370 = vmatprep.subr.bf16.mxu1 %v1365_v7 }
  0x27   :  { %330 = vmatpush1.bf16.msra.mxu0 %v1359_v6 }
  0x28   :  { %331 = vmatprep.subr.bf16.mxu0 %v1378_v9 }
  0x29   :  { %371 = vmatpush1.bf16.msra.mxu1 %v1372_v8 }
  0x2a   :  { %372 = vmatprep.subr.bf16.mxu1 %v1389_v11 }
  0x2b   :  { %332 = vmatpush1.bf16.msra.mxu0 %v1384_v10 }
  0x2c   :  { %333 = vmatprep.subr.bf16.mxu0 %v1395_v12 }
  0x2d   :  { %373 = vmatpush1.bf16.msra.mxu1 %v1401_v13 }
  0x2e   :  { %374 = vmatprep.subr.bf16.mxu1 %v1407_v14 }
  0x2f   :  { %334 = vmatpush1.bf16.msra.mxu0 %v1413_v15 }
  0x30   :  { %335 = vmatprep.subr.bf16.mxu0 %v1419_v16 }
  0x31   :  { %375 = vmatpush1.bf16.msra.mxu1 %v1425_v17 }
  0x32   :  { %376 = vmatprep.subr.bf16.mxu1 %v1431_v18 }
  0x33   :  { %336 = vmatpush1.bf16.msra.mxu0 %v1437_v19 }
  0x34   :  { %337 = vmatprep.subr.bf16.mxu0 %v1443_v20 }
  0x35   :  { %377 = vmatpush1.bf16.msra.mxu1 %v1449_v21 }
  0x36   :  { %378 = vmatprep.subr.bf16.mxu1 %v1455_v22 }
  0x37   :  { %338 = vmatpush1.bf16.msra.mxu0 %v1461_v23 }
  0x38   :  { %339 = vmatprep.subr.bf16.mxu0 %v1467_v24 }
  0x39   :  { %379 = vmatpush1.bf16.msra.mxu1 %v1473_v25 }
  0x3a   :  { %380 = vmatprep.subr.bf16.mxu1 %v1479_v26 }
  0x3b   :  { %340 = vmatpush1.bf16.msra.mxu0 %v1485_v27 }
  0x3c   :  { %341 = vmatprep.subr.bf16.mxu0 %v1491_v28 }
  0x3d   :  { %381 = vmatpush1.bf16.msra.mxu1 %v1497_v29 }
  0x3e   :  { %382 = vmatprep.subr.bf16.mxu1 %v1503_v30 }
  0x3f   :  { %342 = vmatpush1.bf16.msra.mxu0 %v1509_v31 }
  0x40   :  { %437 = vmatprep.subr.bf16.mxu0 %v1329_v0 }
  0x41   :  { %383 = vmatpush1.bf16.msra.mxu1 %v1516_v32 }
  0x42   :  { %478 = vmatprep.subr.bf16.mxu1 %v1343_v3 }
  0xe2   :  { %v252_v38 = vpop.f32.mrf.mxu0 }
  0xe3   :  { %v253_v39 = vadd.f32 %v252_v38, %v54_v35 }
  0xe4   :  { %v254_v41 = vpop.f32.mrf.mxu0  ;;  %v293_v42 = vpop.f32.mrf.mxu1 }
  0xe5   :  { %v300_v43 = vmul.f32 0.5, %v253_v39  ;;  %v255_v44 = vadd.f32 %v254_v41, %v55_v37  ;;  %v294_v48 = vadd.f32 %v293_v42, %v56_v40  ;;  %v1128_v40 = vld [vmem:[%s1920_s0 + $0x10] sm:$0xff] }
  0xe6   :  { %v256_v45 = vpop.f32.mrf.mxu0  ;;  %v295_v46 = vpop.f32.mrf.mxu1  ;;  %v323_v41 = vunpack.c.l.bf16 %v1128_v40  ;;  %v324_v42 = vunpack.c.h.bf16 %v1128_v40 }
  0xe7   :  { %1198 = vtanh.f32 %v300_v43  ;;  %v304_v47 = vmul.f32 0.5, %v255_v44  ;;  %v296_v53 = vadd.f32 %v295_v46, %v57_v52  ;;  %v1129_v44 = vld [vmem:[%s1920_s0 + $0x18] sm:$0xff] }
  0xe8   :  { %v257_v49 = vpop.f32.mrf.mxu0  ;;  %v297_v50 = vpop.f32.mrf.mxu1 }
  0xe9   :  { %1200 = vtanh.f32 %v304_v47  ;;  %v309_v54 = vmul.f32 0.5, %v296_v53  ;;  %v325_v50 = vunpack.c.l.bf16 %v1129_v44 }
  0xea   :  { %v298_v51 = vpop.f32.mrf.mxu1  ;;  %1202 = vtanh.f32 %v294_v48 }
  0xeb   :  { %1204 = vtanh.f32 %v309_v54 }
  0xf4   :  { %v1199_v55 = vpop.eup %1198 }
  0xf5   :  { %v302_v56 = vmul.f32 0.5, %v1199_v55 }
  0xf6   :  { %v1201_v57 = vpop.eup %1200 }
  0xf7   :  { %v303_v58 = vadd.f32 0.5, %v302_v56  ;;  %v306_v59 = vmul.f32 0.5, %v1201_v57  ;;  %v1203_v60 = vpop.eup %1202 }
  0xf8   :  { %v1205_v34 = vpop.eup %1204 }
  0xf9   :  { %v307_v61 = vadd.f32 0.5, %v306_v59  ;;  %v314_v63 = vmul.f32 %v1203_v60, %v303_v58  ;;  %v311_v35 = vmul.f32 0.5, %v1205_v34  ;;  %v326_v58 = vunpack.c.h.bf16 %v1129_v44 }
  0xfb   :  { %v313_v62 = vmul.f32 0.0, %v307_v61  ;;  %v312_v37 = vadd.f32 0.5, %v311_v35 }
  0xfd   :  { %v1563_v33 = vadd.f32 %v314_v63, %v313_v62 }
  0xff   :  { %1206 = vtanh.f32 %v1563_v33 }
 0x10c   :  { %v1207_v36 = vpop.eup %1206 }
 0x10d   :  { %v317_v38 = vmul.f32 %v1207_v36, %v312_v37 }
 0x10f   :  { %v318_v39 = vpack.c.bf16 %v317_v38, %v317_v38 }
 0x111   :  { %319 = vst [vmem:[%s1921_s2] sm:$0xf] %v318_v39  ;;  %360 = vmatmul.mubr.bf16.vlgmr.msra.gmra.mxu0 %v318_v39  ;;  %401 = vmatmul.mubr.bf16.vlgmr.msra.gmra.mxu1 %v318_v39 }
 0x112   :  { %438 = vmatpush1.bf16.msra.mxu0 %v1337_v2  ;;  %479 = vmatpush1.bf16.msra.mxu1 %v1348_v4 }
 0x113   :  { %439 = vmatprep.subr.bf16.mxu0 %v1354_v5  ;;  %480 = vmatprep.subr.bf16.mxu1 %v1365_v7 }
 0x114   :  { %469 = vmatprep.mubr.bf16.mxu0 %v1310_v1  ;;  %510 = vmatprep.mubr.bf16.mxu1 %v1310_v1 }
 0x116   :  { %440 = vmatpush1.bf16.msra.mxu0 %v1359_v6  ;;  %481 = vmatpush1.bf16.msra.mxu1 %v1372_v8 }
 0x117   :  { %441 = vmatprep.subr.bf16.mxu0 %v1378_v9  ;;  %482 = vmatprep.subr.bf16.mxu1 %v1389_v11 }
 0x11a   :  { %442 = vmatpush1.bf16.msra.mxu0 %v1384_v10  ;;  %483 = vmatpush1.bf16.msra.mxu1 %v1401_v13 }
 0x11b   :  { %443 = vmatprep.subr.bf16.mxu0 %v1395_v12  ;;  %484 = vmatprep.subr.bf16.mxu1 %v1407_v14 }
 0x11e   :  { %444 = vmatpush1.bf16.msra.mxu0 %v1413_v15  ;;  %485 = vmatpush1.bf16.msra.mxu1 %v1425_v17 }
 0x11f   :  { %445 = vmatprep.subr.bf16.mxu0 %v1419_v16  ;;  %486 = vmatprep.subr.bf16.mxu1 %v1431_v18 }
 0x122   :  { %446 = vmatpush1.bf16.msra.mxu0 %v1437_v19  ;;  %487 = vmatpush1.bf16.msra.mxu1 %v1449_v21 }
 0x123   :  { %447 = vmatprep.subr.bf16.mxu0 %v1443_v20  ;;  %488 = vmatprep.subr.bf16.mxu1 %v1455_v22 }
 0x126   :  { %448 = vmatpush1.bf16.msra.mxu0 %v1461_v23  ;;  %489 = vmatpush1.bf16.msra.mxu1 %v1473_v25 }
 0x127   :  { %449 = vmatprep.subr.bf16.mxu0 %v1467_v24  ;;  %490 = vmatprep.subr.bf16.mxu1 %v1479_v26 }
 0x12a   :  { %450 = vmatpush1.bf16.msra.mxu0 %v1485_v27  ;;  %491 = vmatpush1.bf16.msra.mxu1 %v1497_v29 }
 0x12b   :  { %451 = vmatprep.subr.bf16.mxu0 %v1491_v28  ;;  %492 = vmatprep.subr.bf16.mxu1 %v1503_v30 }
 0x12e   :  { %452 = vmatpush1.bf16.msra.mxu0 %v1509_v31  ;;  %493 = vmatpush1.bf16.msra.mxu1 %v1516_v32 }
 0x12f   :  { %547 = vmatprep.subr.bf16.mxu0 %v1329_v0  ;;  %588 = vmatprep.subr.bf16.mxu1 %v1343_v3 }
 0x1d1   :  { %v361_v43 = vpop.f32.mrf.mxu0  ;;  %v402_v45 = vpop.f32.mrf.mxu1 }
 0x1d2   :  { %v362_v46 = vadd.f32 %v361_v43, %v323_v41  ;;  %v403_v57 = vadd.f32 %v402_v45, %v325_v50  ;;  %v1132_v50 = vld [vmem:[%s1920_s0 + $0x28] sm:$0xff] }
 0x1d3   :  { %v363_v47 = vpop.f32.mrf.mxu0  ;;  %v404_v48 = vpop.f32.mrf.mxu1 }
 0x1d4   :  { %v409_v49 = vmul.f32 0.5, %v362_v46  ;;  %v364_v51 = vadd.f32 %v363_v47, %v324_v42  ;;  %v405_v59 = vadd.f32 %v404_v48, %v326_v58 }
 0x1d5   :  { %v365_v52 = vpop.f32.mrf.mxu0  ;;  %v406_v53 = vpop.f32.mrf.mxu1 }
 0x1d6   :  { %1208 = vtanh.f32 %v409_v49  ;;  %v413_v54 = vmul.f32 0.5, %v364_v51  ;;  %v418_v60 = vmul.f32 0.5, %v405_v59 }
 0x1d7   :  { %v366_v55 = vpop.f32.mrf.mxu0  ;;  %v407_v56 = vpop.f32.mrf.mxu1 }
 0x1d8   :  { %1210 = vtanh.f32 %v413_v54  ;;  %v435_v56 = vunpack.c.l.bf16 %v1132_v50 }
 0x1d9   :  { %1212 = vtanh.f32 %v403_v57 }
 0x1da   :  { %1214 = vtanh.f32 %v418_v60 }
 0x1e3   :  { %v1209_v61 = vpop.eup %1208 }
 0x1e4   :  { %v411_v62 = vmul.f32 0.5, %v1209_v61 }
 0x1e5   :  { %v1211_v63 = vpop.eup %1210 }
 0x1e6   :  { %v412_v34 = vadd.f32 0.5, %v411_v62  ;;  %v415_v35 = vmul.f32 0.5, %v1211_v63  ;;  %v1213_v36 = vpop.eup %1212 }
 0x1e7   :  { %v1215_v41 = vpop.eup %1214 }
 0x1e8   :  { %v416_v37 = vadd.f32 0.5, %v415_v35  ;;  %v423_v39 = vmul.f32 %v1213_v36, %v412_v34  ;;  %v420_v42 = vmul.f32 0.5, %v1215_v41  ;;  %v436_v34 = vunpack.c.h.bf16 %v1132_v50 }
 0x1ea   :  { %v422_v38 = vmul.f32 %v416_v37, %v1563_v33  ;;  %v421_v43 = vadd.f32 0.5, %v420_v42  ;;  %v1131_v33 = vld [vmem:[%s1920_s0 + $0x20] sm:$0xff] }
 0x1eb   :  { %v433_v47 = vunpack.c.l.bf16 %v1131_v33  ;;  %v434_v48 = vunpack.c.h.bf16 %v1131_v33 }
 0x1ec   :  { %v1610_v40 = vadd.f32 %v423_v39, %v422_v38 }
 0x1ee   :  { %1216 = vtanh.f32 %v1610_v40 }
 0x1fb   :  { %v1217_v44 = vpop.eup %1216 }
 0x1fc   :  { %v426_v45 = vmul.f32 %v1217_v44, %v421_v43 }
 0x1fe   :  { %v427_v46 = vpack.c.bf16 %v426_v45, %v426_v45 }
 0x200   :  { %1130 = vst [vmem:[%s1921_s2 + $0x4] sm:$0xf] %v427_v46  ;;  %470 = vmatmul.mubr.bf16.vlgmr.msra.gmra.mxu0 %v427_v46  ;;  %511 = vmatmul.mubr.bf16.vlgmr.msra.gmra.mxu1 %v427_v46 }
 0x201   :  { %548 = vmatpush1.bf16.msra.mxu0 %v1337_v2  ;;  %589 = vmatpush1.bf16.msra.mxu1 %v1348_v4 }
 0x202   :  { %549 = vmatprep.subr.bf16.mxu0 %v1354_v5  ;;  %590 = vmatprep.subr.bf16.mxu1 %v1365_v7 }
 0x203   :  { %579 = vmatprep.mubr.bf16.mxu0 %v1310_v1  ;;  %620 = vmatprep.mubr.bf16.mxu1 %v1310_v1 }
 0x205   :  { %550 = vmatpush1.bf16.msra.mxu0 %v1359_v6  ;;  %591 = vmatpush1.bf16.msra.mxu1 %v1372_v8 }
 0x206   :  { %551 = vmatprep.subr.bf16.mxu0 %v1378_v9  ;;  %592 = vmatprep.subr.bf16.mxu1 %v1389_v11 }
 0x209   :  { %552 = vmatpush1.bf16.msra.mxu0 %v1384_v10  ;;  %593 = vmatpush1.bf16.msra.mxu1 %v1401_v13 }
 0x20a   :  { %553 = vmatprep.subr.bf16.mxu0 %v1395_v12  ;;  %594 = vmatprep.subr.bf16.mxu1 %v1407_v14 }
 0x20d   :  { %554 = vmatpush1.bf16.msra.mxu0 %v1413_v15  ;;  %595 = vmatpush1.bf16.msra.mxu1 %v1425_v17 }
 0x20e   :  { %555 = vmatprep.subr.bf16.mxu0 %v1419_v16  ;;  %596 = vmatprep.subr.bf16.mxu1 %v1431_v18 }
 0x211   :  { %556 = vmatpush1.bf16.msra.mxu0 %v1437_v19  ;;  %597 = vmatpush1.bf16.msra.mxu1 %v1449_v21 }
 0x212   :  { %557 = vmatprep.subr.bf16.mxu0 %v1443_v20  ;;  %598 = vmatprep.subr.bf16.mxu1 %v1455_v22 }
 0x215   :  { %558 = vmatpush1.bf16.msra.mxu0 %v1461_v23  ;;  %599 = vmatpush1.bf16.msra.mxu1 %v1473_v25 }
 0x216   :  { %559 = vmatprep.subr.bf16.mxu0 %v1467_v24  ;;  %600 = vmatprep.subr.bf16.mxu1 %v1479_v26 }
 0x219   :  { %560 = vmatpush1.bf16.msra.mxu0 %v1485_v27  ;;  %601 = vmatpush1.bf16.msra.mxu1 %v1497_v29 }
 0x21a   :  { %561 = vmatprep.subr.bf16.mxu0 %v1491_v28  ;;  %602 = vmatprep.subr.bf16.mxu1 %v1503_v30 }
 0x21d   :  { %562 = vmatpush1.bf16.msra.mxu0 %v1509_v31  ;;  %603 = vmatpush1.bf16.msra.mxu1 %v1516_v32 }
 0x21e   :  { %657 = vmatprep.subr.bf16.mxu0 %v1329_v0  ;;  %698 = vmatprep.subr.bf16.mxu1 %v1343_v3 }
 0x2c0   :  { %v471_v49 = vpop.f32.mrf.mxu0  ;;  %v512_v51 = vpop.f32.mrf.mxu1 }
 0x2c1   :  { %v472_v52 = vadd.f32 %v471_v49, %v433_v47  ;;  %v513_v63 = vadd.f32 %v512_v51, %v435_v56  ;;  %v1135_v56 = vld [vmem:[%s1920_s0 + $0x38] sm:$0xff] }
 0x2c2   :  { %v473_v53 = vpop.f32.mrf.mxu0  ;;  %v514_v54 = vpop.f32.mrf.mxu1 }
 0x2c3   :  { %v519_v55 = vmul.f32 0.5, %v472_v52  ;;  %v474_v57 = vadd.f32 %v473_v53, %v434_v48  ;;  %v515_v35 = vadd.f32 %v514_v54, %v436_v34 }
 0x2c4   :  { %v475_v58 = vpop.f32.mrf.mxu0  ;;  %v516_v59 = vpop.f32.mrf.mxu1 }
 0x2c5   :  { %1218 = vtanh.f32 %v519_v55  ;;  %v523_v60 = vmul.f32 0.5, %v474_v57  ;;  %v528_v37 = vmul.f32 0.5, %v515_v35 }
 0x2c6   :  { %v476_v61 = vpop.f32.mrf.mxu0  ;;  %v517_v62 = vpop.f32.mrf.mxu1 }
 0x2c7   :  { %1220 = vtanh.f32 %v523_v60  ;;  %v545_v62 = vunpack.c.l.bf16 %v1135_v56 }
 0x2c8   :  { %1222 = vtanh.f32 %v513_v63 }
 0x2c9   :  { %1224 = vtanh.f32 %v528_v37 }
 0x2d2   :  { %v1219_v36 = vpop.eup %1218 }
 0x2d3   :  { %v521_v38 = vmul.f32 0.5, %v1219_v36 }
 0x2d4   :  { %v1221_v39 = vpop.eup %1220 }
 0x2d5   :  { %v522_v41 = vadd.f32 0.5, %v521_v38  ;;  %v525_v42 = vmul.f32 0.5, %v1221_v39  ;;  %v1223_v44 = vpop.eup %1222 }
 0x2d6   :  { %v1225_v47 = vpop.eup %1224 }
 0x2d7   :  { %v526_v43 = vadd.f32 0.5, %v525_v42  ;;  %v533_v46 = vmul.f32 %v1223_v44, %v522_v41  ;;  %v530_v48 = vmul.f32 0.5, %v1225_v47  ;;  %v546_v41 = vunpack.c.h.bf16 %v1135_v56 }
 0x2d9   :  { %v532_v45 = vmul.f32 %v526_v43, %v1610_v40  ;;  %v531_v49 = vadd.f32 0.5, %v530_v48  ;;  %v1134_v40 = vld [vmem:[%s1920_s0 + $0x30] sm:$0xff] }
 0x2da   :  { %v543_v53 = vunpack.c.l.bf16 %v1134_v40  ;;  %v544_v54 = vunpack.c.h.bf16 %v1134_v40 }
 0x2db   :  { %v1657_v33 = vadd.f32 %v533_v46, %v532_v45 }
 0x2dd   :  { %1226 = vtanh.f32 %v1657_v33 }
 0x2ea   :  { %v1227_v50 = vpop.eup %1226 }
 0x2eb   :  { %v536_v51 = vmul.f32 %v1227_v50, %v531_v49 }
 0x2ed   :  { %v537_v52 = vpack.c.bf16 %v536_v51, %v536_v51 }
 0x2ef   :  { %1133 = vst [vmem:[%s1921_s2 + $0x8] sm:$0xf] %v537_v52  ;;  %580 = vmatmul.mubr.bf16.vlgmr.msra.gmra.mxu0 %v537_v52  ;;  %621 = vmatmul.mubr.bf16.vlgmr.msra.gmra.mxu1 %v537_v52 }
 0x2f0   :  { %658 = vmatpush1.bf16.msra.mxu0 %v1337_v2  ;;  %699 = vmatpush1.bf16.msra.mxu1 %v1348_v4 }
 0x2f1   :  { %659 = vmatprep.subr.bf16.mxu0 %v1354_v5  ;;  %700 = vmatprep.subr.bf16.mxu1 %v1365_v7 }
 0x2f2   :  { %689 = vmatprep.mubr.bf16.mxu0 %v1310_v1  ;;  %730 = vmatprep.mubr.bf16.mxu1 %v1310_v1 }
 0x2f4   :  { %660 = vmatpush1.bf16.msra.mxu0 %v1359_v6  ;;  %701 = vmatpush1.bf16.msra.mxu1 %v1372_v8 }
 0x2f5   :  { %661 = vmatprep.subr.bf16.mxu0 %v1378_v9  ;;  %702 = vmatprep.subr.bf16.mxu1 %v1389_v11 }
 0x2f8   :  { %662 = vmatpush1.bf16.msra.mxu0 %v1384_v10  ;;  %703 = vmatpush1.bf16.msra.mxu1 %v1401_v13 }
 0x2f9   :  { %663 = vmatprep.subr.bf16.mxu0 %v1395_v12  ;;  %704 = vmatprep.subr.bf16.mxu1 %v1407_v14 }
 0x2fc   :  { %664 = vmatpush1.bf16.msra.mxu0 %v1413_v15  ;;  %705 = vmatpush1.bf16.msra.mxu1 %v1425_v17 }
 0x2fd   :  { %665 = vmatprep.subr.bf16.mxu0 %v1419_v16  ;;  %706 = vmatprep.subr.bf16.mxu1 %v1431_v18 }
 0x300   :  { %666 = vmatpush1.bf16.msra.mxu0 %v1437_v19  ;;  %707 = vmatpush1.bf16.msra.mxu1 %v1449_v21 }
 0x301   :  { %667 = vmatprep.subr.bf16.mxu0 %v1443_v20  ;;  %708 = vmatprep.subr.bf16.mxu1 %v1455_v22 }
 0x304   :  { %668 = vmatpush1.bf16.msra.mxu0 %v1461_v23  ;;  %709 = vmatpush1.bf16.msra.mxu1 %v1473_v25 }
 0x305   :  { %669 = vmatprep.subr.bf16.mxu0 %v1467_v24  ;;  %710 = vmatprep.subr.bf16.mxu1 %v1479_v26 }
 0x308   :  { %670 = vmatpush1.bf16.msra.mxu0 %v1485_v27  ;;  %711 = vmatpush1.bf16.msra.mxu1 %v1497_v29 }
 0x309   :  { %671 = vmatprep.subr.bf16.mxu0 %v1491_v28  ;;  %712 = vmatprep.subr.bf16.mxu1 %v1503_v30 }
 0x30c   :  { %672 = vmatpush1.bf16.msra.mxu0 %v1509_v31  ;;  %713 = vmatpush1.bf16.msra.mxu1 %v1516_v32 }
 0x30d   :  { %767 = vmatprep.subr.bf16.mxu0 %v1329_v0  ;;  %808 = vmatprep.subr.bf16.mxu1 %v1343_v3 }
 0x3af   :  { %v581_v55 = vpop.f32.mrf.mxu0  ;;  %v622_v57 = vpop.f32.mrf.mxu1 }
 0x3b0   :  { %v582_v58 = vadd.f32 %v581_v55, %v543_v53  ;;  %v623_v39 = vadd.f32 %v622_v57, %v545_v62  ;;  %v1138_v62 = vld [vmem:[%s1920_s0 + $0x48] sm:$0xff] }
 0x3b1   :  { %v583_v59 = vpop.f32.mrf.mxu0  ;;  %v624_v60 = vpop.f32.mrf.mxu1 }
 0x3b2   :  { %v629_v61 = vmul.f32 0.5, %v582_v58  ;;  %v584_v63 = vadd.f32 %v583_v59, %v544_v54  ;;  %v625_v42 = vadd.f32 %v624_v60, %v546_v41 }
 0x3b3   :  { %v585_v34 = vpop.f32.mrf.mxu0  ;;  %v626_v35 = vpop.f32.mrf.mxu1 }
 0x3b4   :  { %1228 = vtanh.f32 %v629_v61  ;;  %v633_v37 = vmul.f32 0.5, %v584_v63  ;;  %v638_v43 = vmul.f32 0.5, %v625_v42 }
 0x3b5   :  { %v586_v36 = vpop.f32.mrf.mxu0  ;;  %v627_v38 = vpop.f32.mrf.mxu1 }
 0x3b6   :  { %1230 = vtanh.f32 %v633_v37  ;;  %v655_v38 = vunpack.c.l.bf16 %v1138_v62 }
 0x3b7   :  { %1232 = vtanh.f32 %v623_v39 }
 0x3b8   :  { %1234 = vtanh.f32 %v638_v43 }
 0x3c1   :  { %v1229_v44 = vpop.eup %1228 }
 0x3c2   :  { %v631_v45 = vmul.f32 0.5, %v1229_v44 }
 0x3c3   :  { %v1231_v46 = vpop.eup %1230 }
 0x3c4   :  { %v632_v47 = vadd.f32 0.5, %v631_v45  ;;  %v635_v48 = vmul.f32 0.5, %v1231_v46  ;;  %v1233_v50 = vpop.eup %1232  ;;  %v656_v45 = vunpack.c.h.bf16 %v1138_v62 }
 0x3c5   :  { %v1235_v53 = vpop.eup %1234 }
 0x3c6   :  { %v636_v49 = vadd.f32 0.5, %v635_v48  ;;  %v643_v52 = vmul.f32 %v1233_v50, %v632_v47  ;;  %v640_v54 = vmul.f32 0.5, %v1235_v53 }
 0x3c8   :  { %v642_v51 = vmul.f32 %v636_v49, %v1657_v33  ;;  %v641_v55 = vadd.f32 0.5, %v640_v54  ;;  %v1137_v33 = vld [vmem:[%s1920_s0 + $0x40] sm:$0xff] }
 0x3c9   :  { %v653_v59 = vunpack.c.l.bf16 %v1137_v33  ;;  %v654_v60 = vunpack.c.h.bf16 %v1137_v33 }
 0x3ca   :  { %v1704_v40 = vadd.f32 %v643_v52, %v642_v51 }
 0x3cc   :  { %1236 = vtanh.f32 %v1704_v40 }
 0x3d9   :  { %v1237_v56 = vpop.eup %1236 }
 0x3da   :  { %v646_v57 = vmul.f32 %v1237_v56, %v641_v55 }
 0x3dc   :  { %v647_v58 = vpack.c.bf16 %v646_v57, %v646_v57 }
 0x3de   :  { %1136 = vst [vmem:[%s1921_s2 + $0xc] sm:$0xf] %v647_v58  ;;  %690 = vmatmul.mubr.bf16.vlgmr.msra.gmra.mxu0 %v647_v58  ;;  %731 = vmatmul.mubr.bf16.vlgmr.msra.gmra.mxu1 %v647_v58 }
 0x3df   :  { %768 = vmatpush1.bf16.msra.mxu0 %v1337_v2  ;;  %809 = vmatpush1.bf16.msra.mxu1 %v1348_v4 }
 0x3e0   :  { %769 = vmatprep.subr.bf16.mxu0 %v1354_v5  ;;  %810 = vmatprep.subr.bf16.mxu1 %v1365_v7 }
 0x3e1   :  { %799 = vmatprep.mubr.bf16.mxu0 %v1310_v1  ;;  %840 = vmatprep.mubr.bf16.mxu1 %v1310_v1 }
 0x3e3   :  { %770 = vmatpush1.bf16.msra.mxu0 %v1359_v6  ;;  %811 = vmatpush1.bf16.msra.mxu1 %v1372_v8 }
 0x3e4   :  { %771 = vmatprep.subr.bf16.mxu0 %v1378_v9  ;;  %812 = vmatprep.subr.bf16.mxu1 %v1389_v11 }
 0x3e7   :  { %772 = vmatpush1.bf16.msra.mxu0 %v1384_v10  ;;  %813 = vmatpush1.bf16.msra.mxu1 %v1401_v13 }
 0x3e8   :  { %773 = vmatprep.subr.bf16.mxu0 %v1395_v12  ;;  %814 = vmatprep.subr.bf16.mxu1 %v1407_v14 }
 0x3eb   :  { %774 = vmatpush1.bf16.msra.mxu0 %v1413_v15  ;;  %815 = vmatpush1.bf16.msra.mxu1 %v1425_v17 }
 0x3ec   :  { %775 = vmatprep.subr.bf16.mxu0 %v1419_v16  ;;  %816 = vmatprep.subr.bf16.mxu1 %v1431_v18 }
 0x3ef   :  { %776 = vmatpush1.bf16.msra.mxu0 %v1437_v19  ;;  %817 = vmatpush1.bf16.msra.mxu1 %v1449_v21 }
 0x3f0   :  { %777 = vmatprep.subr.bf16.mxu0 %v1443_v20  ;;  %818 = vmatprep.subr.bf16.mxu1 %v1455_v22 }
 0x3f3   :  { %778 = vmatpush1.bf16.msra.mxu0 %v1461_v23  ;;  %819 = vmatpush1.bf16.msra.mxu1 %v1473_v25 }
 0x3f4   :  { %779 = vmatprep.subr.bf16.mxu0 %v1467_v24  ;;  %820 = vmatprep.subr.bf16.mxu1 %v1479_v26 }
 0x3f7   :  { %780 = vmatpush1.bf16.msra.mxu0 %v1485_v27  ;;  %821 = vmatpush1.bf16.msra.mxu1 %v1497_v29 }
 0x3f8   :  { %781 = vmatprep.subr.bf16.mxu0 %v1491_v28  ;;  %822 = vmatprep.subr.bf16.mxu1 %v1503_v30 }
 0x3fb   :  { %782 = vmatpush1.bf16.msra.mxu0 %v1509_v31  ;;  %823 = vmatpush1.bf16.msra.mxu1 %v1516_v32 }
 0x3fc   :  { %877 = vmatprep.subr.bf16.mxu0 %v1329_v0  ;;  %918 = vmatprep.subr.bf16.mxu1 %v1343_v3 }
 0x49e   :  { %v691_v61 = vpop.f32.mrf.mxu0  ;;  %v732_v63 = vpop.f32.mrf.mxu1 }
 0x49f   :  { %v692_v34 = vadd.f32 %v691_v61, %v653_v59  ;;  %v733_v44 = vadd.f32 %v732_v63, %v655_v38 }
 0x4a0   :  { %v693_v35 = vpop.f32.mrf.mxu0  ;;  %v734_v37 = vpop.f32.mrf.mxu1 }
 0x4a1   :  { %v739_v36 = vmul.f32 0.5, %v692_v34  ;;  %v694_v0 = vadd.f32 %v693_v35, %v654_v60  ;;  %v735_v46 = vadd.f32 %v734_v37, %v656_v45  ;;  %v1285_v45 = vld [vmem:[%s1919_s1 + $0xc8] ss:$16 sps:$4 sm:$0xff]  }
 0x4a2   :  { %v695_v39 = vpop.f32.mrf.mxu0  ;;  %v736_v3 = vpop.f32.mrf.mxu1 }
 0x4a3   :  { %1238 = vtanh.f32 %v739_v36  ;;  %v743_v41 = vmul.f32 0.5, %v694_v0  ;;  %v748_v47 = vmul.f32 0.5, %v735_v46  ;;  %v1280_v3 = vld [vmem:[%s1919_s1 + $0xe0] ss:$16 sps:$4 sm:$0xff]   ;;  %v1286_v46 = vld [vmem:[%s1919_s1 + $0xa4] ss:$16 sps:$4 sm:$0xff]  }
 0x4a4   :  { %v696_v42 = vpop.f32.mrf.mxu0  ;;  %v737_v43 = vpop.f32.mrf.mxu1 }
 0x4a5   :  { %1240 = vtanh.f32 %v743_v41  ;;  %v1281_v41 = vld [vmem:[%s1919_s1 + $0xe8] ss:$16 sps:$4 sm:$0xff]   ;;  %v1282_v42 = vld [vmem:[%s1919_s1 + $0xc4] ss:$16 sps:$4 sm:$0xff]   ;;  %v1283_v43 = vld [vmem:[%s1919_s1 + $0xcc] ss:$16 sps:$4 sm:$0xff]  }
 0x4a6   :  { %1242 = vtanh.f32 %v733_v44  ;;  %v1284_v44 = vld [vmem:[%s1919_s1 + $0xc0] ss:$16 sps:$4 sm:$0xff]  }
 0x4a7   :  { %1244 = vtanh.f32 %v748_v47  ;;  %v1287_v47 = vld [vmem:[%s1919_s1 + $0xac] ss:$16 sps:$4 sm:$0xff]  }
 0x4b0   :  { %v1239_v48 = vpop.eup %1238 }
 0x4b1   :  { %v741_v49 = vmul.f32 0.5, %v1239_v48  ;;  %v1289_v48 = vld [vmem:[%s1919_s1 + $0xa8] ss:$16 sps:$4 sm:$0xff]  }
 0x4b2   :  { %v1241_v50 = vpop.eup %1240 }
 0x4b3   :  { %v742_v51 = vadd.f32 0.5, %v741_v49  ;;  %v745_v52 = vmul.f32 0.5, %v1241_v50  ;;  %v1243_v54 = vpop.eup %1242  ;;  %v1290_v49 = vld [vmem:[%s1919_s1 + $0x84] ss:$16 sps:$4 sm:$0xff]   ;;  %v1291_v50 = vld [vmem:[%s1919_s1 + $0x8c] ss:$16 sps:$4 sm:$0xff]  }
 0x4b4   :  { %v1245_v58 = vpop.eup %1244 }
 0x4b5   :  { %v746_v53 = vadd.f32 0.5, %v745_v52  ;;  %v753_v56 = vmul.f32 %v1243_v54, %v742_v51  ;;  %v750_v33 = vmul.f32 0.5, %v1245_v58  ;;  %v1292_v51 = vld [vmem:[%s1919_s1 + $0x80] ss:$16 sps:$4 sm:$0xff]   ;;  %v1293_v52 = vld [vmem:[%s1919_s1 + $0x88] ss:$16 sps:$4 sm:$0xff]  }
 0x4b6   :  { %v1295_v54 = vld [vmem:[%s1919_s1 + $0x6c] ss:$16 sps:$4 sm:$0xff]  }
 0x4b7   :  { %v752_v55 = vmul.f32 %v746_v53, %v1704_v40  ;;  %v751_v59 = vadd.f32 0.5, %v750_v33  ;;  %v1294_v53 = vld [vmem:[%s1919_s1 + $0x64] ss:$16 sps:$4 sm:$0xff]   ;;  %v1299_v58 = vld [vmem:[%s1919_s1 + $0x4c] ss:$16 sps:$4 sm:$0xff]  }
 0x4b8   :  { %v1300_v33 = vld [vmem:[%s1919_s1 + $0x40] ss:$16 sps:$4 sm:$0xff]  }
 0x4b9   :  { %v1751_v57 = vadd.f32 %v753_v56, %v752_v55  ;;  %v1296_v55 = vld [vmem:[%s1919_s1 + $0x60] ss:$16 sps:$4 sm:$0xff]   ;;  %v1297_v56 = vld [vmem:[%s1919_s1 + $0x68] ss:$16 sps:$4 sm:$0xff]  }
 0x4bb   :  { %1246 = vtanh.f32 %v1751_v57 }
 0x4c8   :  { %v1247_v60 = vpop.eup %1246 }
 0x4c9   :  { %v756_v61 = vmul.f32 %v1247_v60, %v751_v59  ;;  %v1301_v59 = vld [vmem:[%s1919_s1 + $0x48] ss:$16 sps:$4 sm:$0xff]   ;;  %v1302_v60 = vld [vmem:[%s1919_s1 + $0x24] ss:$16 sps:$4 sm:$0xff]  }
 0x4cb   :  { %v757_v62 = vpack.c.bf16 %v756_v61, %v756_v61  ;;  %v1303_v61 = vld [vmem:[%s1919_s1 + $0x2c] ss:$16 sps:$4 sm:$0xff]  }
 0x4cd   :  { %1139 = vst [vmem:[%s1921_s2 + $0x10] sm:$0xf] %v757_v62  ;;  %800 = vmatmul.mubr.bf16.vlgmr.msra.gmra.mxu0 %v757_v62  ;;  %841 = vmatmul.mubr.bf16.vlgmr.msra.gmra.mxu1 %v757_v62  ;;  %v1304_v62 = vld [vmem:[%s1919_s1 + $0x20] ss:$16 sps:$4 sm:$0xff]  }
 0x4ce   :  { %878 = vmatpush1.bf16.msra.mxu0 %v1337_v2  ;;  %919 = vmatpush1.bf16.msra.mxu1 %v1348_v4  ;;  %v1278_v2 = vld [vmem:[%s1919_s1 + $0xe4] ss:$16 sps:$4 sm:$0xff]   ;;  %v1279_v4 = vld [vmem:[%s1919_s1 + $0xec] ss:$16 sps:$4 sm:$0xff]  }
 0x4cf   :  { %879 = vmatprep.subr.bf16.mxu0 %v1354_v5  ;;  %920 = vmatprep.subr.bf16.mxu1 %v1365_v7  ;;  %v1140_v5 = vld [vmem:[%s1920_s0 + $0x50] sm:$0xff] }
 0x4d0   :  { %909 = vmatprep.mubr.bf16.mxu0 %v1310_v1  ;;  %950 = vmatprep.mubr.bf16.mxu1 %v1310_v1  ;;  %v764_v7 = vunpack.c.h.bf16 %v1140_v5 }
 0x4d2   :  { %880 = vmatpush1.bf16.msra.mxu0 %v1359_v6  ;;  %921 = vmatpush1.bf16.msra.mxu1 %v1372_v8  ;;  %v763_v6 = vunpack.c.l.bf16 %v1140_v5  ;;  %v1307_v5 = vld [vmem:[%s1919_s1 + $0xc] ss:$16 sps:$4 sm:$0xff]  }
 0x4d3   :  { %881 = vmatprep.subr.bf16.mxu0 %v1378_v9  ;;  %922 = vmatprep.subr.bf16.mxu1 %v1389_v11  ;;  %v1141_v9 = vld [vmem:[%s1920_s0 + $0x58] sm:$0xff] }
 0x4d6   :  { %882 = vmatpush1.bf16.msra.mxu0 %v1384_v10  ;;  %923 = vmatpush1.bf16.msra.mxu1 %v1401_v13 }
 0x4d7   :  { %883 = vmatprep.subr.bf16.mxu0 %v1395_v12  ;;  %924 = vmatprep.subr.bf16.mxu1 %v1407_v14 }
 0x4da   :  { %884 = vmatpush1.bf16.msra.mxu0 %v1413_v15  ;;  %925 = vmatpush1.bf16.msra.mxu1 %v1425_v17  ;;  %v765_v15 = vunpack.c.l.bf16 %v1141_v9 }
 0x4db   :  { %885 = vmatprep.subr.bf16.mxu0 %v1419_v16  ;;  %926 = vmatprep.subr.bf16.mxu1 %v1431_v18 }
 0x4de   :  { %886 = vmatpush1.bf16.msra.mxu0 %v1437_v19  ;;  %927 = vmatpush1.bf16.msra.mxu1 %v1449_v21 }
 0x4df   :  { %887 = vmatprep.subr.bf16.mxu0 %v1443_v20  ;;  %928 = vmatprep.subr.bf16.mxu1 %v1455_v22 }
 0x4e2   :  { %888 = vmatpush1.bf16.msra.mxu0 %v1461_v23  ;;  %929 = vmatpush1.bf16.msra.mxu1 %v1473_v25  ;;  %v766_v23 = vunpack.c.h.bf16 %v1141_v9 }
 0x4e3   :  { %889 = vmatprep.subr.bf16.mxu0 %v1467_v24  ;;  %930 = vmatprep.subr.bf16.mxu1 %v1479_v26 }
 0x4e6   :  { %890 = vmatpush1.bf16.msra.mxu0 %v1485_v27  ;;  %931 = vmatpush1.bf16.msra.mxu1 %v1497_v29 }
 0x4e7   :  { %891 = vmatprep.subr.bf16.mxu0 %v1491_v28  ;;  %932 = vmatprep.subr.bf16.mxu1 %v1503_v30 }
 0x4ea   :  { %892 = vmatpush1.bf16.msra.mxu0 %v1509_v31  ;;  %933 = vmatpush1.bf16.msra.mxu1 %v1516_v32 }
 0x4eb   :  { %987 = vmatprep.subr.bf16.mxu0 %v1278_v2  ;;  %1028 = vmatprep.subr.bf16.mxu1 %v1279_v4  ;;  %v1305_v2 = vld [vmem:[%s1919_s1 + $0x28] ss:$16 sps:$4 sm:$0xff]   ;;  %v1306_v4 = vld [vmem:[%s1919_s1 + $0x4] ss:$16 sps:$4 sm:$0xff]  }
 0x58d   :  { %v801_v8 = vpop.f32.mrf.mxu0  ;;  %v842_v10 = vpop.f32.mrf.mxu1 }
 0x58e   :  { %v802_v11 = vadd.f32 %v801_v8, %v763_v6  ;;  %v843_v22 = vadd.f32 %v842_v10, %v765_v15  ;;  %v1308_v6 = vld [vmem:[%s1919_s1] ss:$16 sps:$4 sm:$0xff]  }
 0x58f   :  { %v803_v12 = vpop.f32.mrf.mxu0  ;;  %v844_v13 = vpop.f32.mrf.mxu1  ;;  %v1143_v8 = vld [vmem:[%s1920_s0 + $0x60] sm:$0xff] }
 0x590   :  { %v849_v14 = vmul.f32 0.5, %v802_v11  ;;  %v804_v16 = vadd.f32 %v803_v12, %v764_v7  ;;  %v845_v24 = vadd.f32 %v844_v13, %v766_v23  ;;  %v1309_v7 = vld [vmem:[%s1919_s1 + $0x8] ss:$16 sps:$4 sm:$0xff]   ;;  %v873_v9 = vunpack.c.l.bf16 %v1143_v8 }
 0x591   :  { %v805_v17 = vpop.f32.mrf.mxu0  ;;  %v846_v18 = vpop.f32.mrf.mxu1  ;;  %v874_v10 = vunpack.c.h.bf16 %v1143_v8  ;;  %v1144_v12 = vld [vmem:[%s1920_s0 + $0x68] sm:$0xff] }
 0x592   :  { %1248 = vtanh.f32 %v849_v14  ;;  %v853_v19 = vmul.f32 0.5, %v804_v16  ;;  %v858_v25 = vmul.f32 0.5, %v845_v24  ;;  %v875_v18 = vunpack.c.l.bf16 %v1144_v12 }
 0x593   :  { %v806_v20 = vpop.f32.mrf.mxu0  ;;  %v847_v21 = vpop.f32.mrf.mxu1 }
 0x594   :  { %1250 = vtanh.f32 %v853_v19 }
 0x595   :  { %1252 = vtanh.f32 %v843_v22 }
 0x596   :  { %1254 = vtanh.f32 %v858_v25 }
 0x59f   :  { %v1249_v26 = vpop.eup %1248 }
 0x5a0   :  { %v851_v27 = vmul.f32 0.5, %v1249_v26  ;;  %v876_v26 = vunpack.c.h.bf16 %v1144_v12 }
 0x5a1   :  { %v1251_v28 = vpop.eup %1250 }
 0x5a2   :  { %v852_v29 = vadd.f32 0.5, %v851_v27  ;;  %v855_v30 = vmul.f32 0.5, %v1251_v28  ;;  %v1253_v32 = vpop.eup %1252 }
 0x5a3   :  { %v1255_v35 = vpop.eup %1254 }
 0x5a4   :  { %v856_v31 = vadd.f32 0.5, %v855_v30  ;;  %v863_v63 = vmul.f32 %v1253_v32, %v852_v29  ;;  %v860_v37 = vmul.f32 0.5, %v1255_v35 }
 0x5a6   :  { %v862_v40 = vmul.f32 %v856_v31, %v1751_v57  ;;  %v861_v36 = vadd.f32 0.5, %v860_v37  ;;  %v1298_v57 = vld [vmem:[%s1919_s1 + $0x44] ss:$16 sps:$4 sm:$0xff]  }
 0x5a8   :  { %v1802_v34 = vadd.f32 %v863_v63, %v862_v40 }
 0x5aa   :  { %1256 = vtanh.f32 %v1802_v34 }
 0x5b7   :  { %v1257_v38 = vpop.eup %1256 }
 0x5b8   :  { %v866_v0 = vmul.f32 %v1257_v38, %v861_v36 }
 0x5ba   :  { %v867_v39 = vpack.c.bf16 %v866_v0, %v866_v0 }
 0x5bc   :  { %1142 = vst [vmem:[%s1921_s2 + $0x14] sm:$0xf] %v867_v39  ;;  %910 = vmatmul.mubr.bf16.vlgmr.msra.gmra.mxu0 %v867_v39  ;;  %951 = vmatmul.mubr.bf16.vlgmr.msra.gmra.mxu1 %v867_v39 }
 0x5bd   :  { %988 = vmatpush1.bf16.msra.mxu0 %v1280_v3  ;;  %1029 = vmatpush1.bf16.msra.mxu1 %v1281_v41 }
 0x5be   :  { %989 = vmatprep.subr.bf16.mxu0 %v1282_v42  ;;  %1030 = vmatprep.subr.bf16.mxu1 %v1283_v43 }
 0x5bf   :  { %1019 = vmatprep.mubr.bf16.mxu0 %v1310_v1  ;;  %1060 = vmatprep.mubr.bf16.mxu1 %v1310_v1  ;;  %v1288_v1 = vld [vmem:[%s1919_s1 + $0xa0] ss:$16 sps:$4 sm:$0xff]  }
 0x5c1   :  { %990 = vmatpush1.bf16.msra.mxu0 %v1284_v44  ;;  %1031 = vmatpush1.bf16.msra.mxu1 %v1285_v45  ;;  %v1146_v44 = vld [vmem:[%s1920_s0 + $0x70] sm:$0xff] }
 0x5c2   :  { %991 = vmatprep.subr.bf16.mxu0 %v1286_v46  ;;  %1032 = vmatprep.subr.bf16.mxu1 %v1287_v47  ;;  %v984_v45 = vunpack.c.h.bf16 %v1146_v44  ;;  %v1147_v47 = vld [vmem:[%s1920_s0 + $0x78] sm:$0xff] }
 0x5c5   :  { %992 = vmatpush1.bf16.msra.mxu0 %v1288_v1  ;;  %1033 = vmatpush1.bf16.msra.mxu1 %v1289_v48 }
 0x5c6   :  { %993 = vmatprep.subr.bf16.mxu0 %v1290_v49  ;;  %1034 = vmatprep.subr.bf16.mxu1 %v1291_v50 }
 0x5c9   :  { %994 = vmatpush1.bf16.msra.mxu0 %v1292_v51  ;;  %1035 = vmatpush1.bf16.msra.mxu1 %v1293_v52  ;;  %v985_v52 = vunpack.c.l.bf16 %v1147_v47 }
 0x5ca   :  { %995 = vmatprep.subr.bf16.mxu0 %v1294_v53  ;;  %1036 = vmatprep.subr.bf16.mxu1 %v1295_v54 }
 0x5cd   :  { %996 = vmatpush1.bf16.msra.mxu0 %v1296_v55  ;;  %1037 = vmatpush1.bf16.msra.mxu1 %v1297_v56 }
 0x5ce   :  { %997 = vmatprep.subr.bf16.mxu0 %v1298_v57  ;;  %1038 = vmatprep.subr.bf16.mxu1 %v1299_v58 }
 0x5d1   :  { %998 = vmatpush1.bf16.msra.mxu0 %v1300_v33  ;;  %1039 = vmatpush1.bf16.msra.mxu1 %v1301_v59  ;;  %v986_v59 = vunpack.c.h.bf16 %v1147_v47 }
 0x5d2   :  { %999 = vmatprep.subr.bf16.mxu0 %v1302_v60  ;;  %1040 = vmatprep.subr.bf16.mxu1 %v1303_v61 }
 0x5d5   :  { %1000 = vmatpush1.bf16.msra.mxu0 %v1304_v62  ;;  %1041 = vmatpush1.bf16.msra.mxu1 %v1305_v2 }
 0x5d6   :  { %1001 = vmatprep.subr.bf16.mxu0 %v1306_v4  ;;  %1042 = vmatprep.subr.bf16.mxu1 %v1307_v5 }
 0x5d9   :  { %1002 = vmatpush1.bf16.msra.mxu0 %v1308_v6  ;;  %1043 = vmatpush1.bf16.msra.mxu1 %v1309_v7 }
 0x67c   :  { %v911_v11 = vpop.f32.mrf.mxu0  ;;  %v952_v13 = vpop.f32.mrf.mxu1 }
 0x67d   :  { %v912_v14 = vadd.f32 %v911_v11, %v873_v9  ;;  %v953_v25 = vadd.f32 %v952_v13, %v875_v18 }
 0x67e   :  { %v913_v15 = vpop.f32.mrf.mxu0  ;;  %v954_v16 = vpop.f32.mrf.mxu1 }
 0x67f   :  { %v959_v17 = vmul.f32 0.5, %v912_v14  ;;  %v914_v19 = vadd.f32 %v913_v15, %v874_v10  ;;  %v955_v27 = vadd.f32 %v954_v16, %v876_v26 }
 0x680   :  { %v915_v20 = vpop.f32.mrf.mxu0  ;;  %v956_v21 = vpop.f32.mrf.mxu1 }
 0x681   :  { %1258 = vtanh.f32 %v959_v17  ;;  %v963_v22 = vmul.f32 0.5, %v914_v19  ;;  %v968_v28 = vmul.f32 0.5, %v955_v27 }
 0x682   :  { %v916_v23 = vpop.f32.mrf.mxu0  ;;  %v957_v24 = vpop.f32.mrf.mxu1 }
 0x683   :  { %1260 = vtanh.f32 %v963_v22 }
 0x684   :  { %1262 = vtanh.f32 %v953_v25 }
 0x685   :  { %1264 = vtanh.f32 %v968_v28 }
 0x68e   :  { %v1259_v29 = vpop.eup %1258 }
 0x68f   :  { %v961_v30 = vmul.f32 0.5, %v1259_v29 }
 0x690   :  { %v1261_v31 = vpop.eup %1260 }
 0x691   :  { %v962_v32 = vadd.f32 0.5, %v961_v30  ;;  %v965_v40 = vmul.f32 0.5, %v1261_v31  ;;  %v1263_v35 = vpop.eup %1262 }
 0x692   :  { %v1265_v0 = vpop.eup %1264 }
 0x693   :  { %v966_v63 = vadd.f32 0.5, %v965_v40  ;;  %v973_v36 = vmul.f32 %v1263_v35, %v962_v32  ;;  %v970_v39 = vmul.f32 0.5, %v1265_v0 }
 0x695   :  { %v972_v37 = vmul.f32 %v966_v63, %v1802_v34  ;;  %v971_v3 = vadd.f32 0.5, %v970_v39  ;;  %v983_v34 = vunpack.c.l.bf16 %v1146_v44 }
 0x697   :  { %v974_v38 = vadd.f32 %v973_v36, %v972_v37 }
 0x699   :  { %1266 = vtanh.f32 %v974_v38 }
 0x6a6   :  { %v1267_v41 = vpop.eup %1266 }
 0x6a7   :  { %v976_v42 = vmul.f32 %v1267_v41, %v971_v3 }
 0x6a9   :  { %v977_v43 = vpack.c.bf16 %v976_v42, %v976_v42 }
 0x6ab   :  { %1145 = vst [vmem:[%s1921_s2 + $0x18] sm:$0xf] %v977_v43  ;;  %1020 = vmatmul.mubr.bf16.vlgmr.msra.gmra.mxu0 %v977_v43  ;;  %1061 = vmatmul.mubr.bf16.vlgmr.msra.gmra.mxu1 %v977_v43 }
 0x76b   :  { %v1021_v46 = vpop.f32.mrf.mxu0  ;;  %v1062_v1 = vpop.f32.mrf.mxu1 }
 0x76c   :  { %v1022_v48 = vadd.f32 %v1021_v46, %v983_v34  ;;  %v1063_v33 = vadd.f32 %v1062_v1, %v985_v52 }
 0x76d   :  { %v1023_v49 = vpop.f32.mrf.mxu0  ;;  %v1064_v50 = vpop.f32.mrf.mxu1 }
 0x76e   :  { %v1069_v51 = vmul.f32 0.5, %v1022_v48  ;;  %v1024_v53 = vadd.f32 %v1023_v49, %v984_v45  ;;  %v1065_v60 = vadd.f32 %v1064_v50, %v986_v59 }
 0x76f   :  { %v1025_v54 = vpop.f32.mrf.mxu0  ;;  %v1066_v55 = vpop.f32.mrf.mxu1 }
 0x770   :  { %1268 = vtanh.f32 %v1069_v51  ;;  %v1073_v56 = vmul.f32 0.5, %v1024_v53  ;;  %v1078_v61 = vmul.f32 0.5, %v1065_v60 }
 0x771   :  { %v1026_v57 = vpop.f32.mrf.mxu0  ;;  %v1067_v58 = vpop.f32.mrf.mxu1 }
 0x772   :  { %1270 = vtanh.f32 %v1073_v56 }
 0x773   :  { %1272 = vtanh.f32 %v1063_v33 }
 0x774   :  { %1274 = vtanh.f32 %v1078_v61 }
 0x77d   :  { %v1269_v62 = vpop.eup %1268 }
 0x77e   :  { %v1071_v2 = vmul.f32 0.5, %v1269_v62 }
 0x77f   :  { %v1271_v4 = vpop.eup %1270 }
 0x780   :  { %v1072_v5 = vadd.f32 0.5, %v1071_v2  ;;  %v1075_v6 = vmul.f32 0.5, %v1271_v4  ;;  %v1273_v8 = vpop.eup %1272 }
 0x781   :  { %v1275_v12 = vpop.eup %1274 }
 0x782   :  { %v1076_v7 = vadd.f32 0.5, %v1075_v6  ;;  %v1083_v10 = vmul.f32 %v1273_v8, %v1072_v5  ;;  %v1080_v13 = vmul.f32 0.5, %v1275_v12 }
 0x784   :  { %v1082_v9 = vmul.f32 %v1076_v7, %v974_v38  ;;  %v1081_v14 = vadd.f32 0.5, %v1080_v13 }
 0x786   :  { %v1084_v11 = vadd.f32 %v1083_v10, %v1082_v9 }
 0x788   :  { %1276 = vtanh.f32 %v1084_v11 }
 0x795   :  { %v1277_v15 = vpop.eup %1276 }
 0x796   :  { %v1086_v16 = vmul.f32 %v1277_v15, %v1081_v14 }
 0x798   :  { %v1087_v17 = vpack.c.bf16 %v1086_v16, %v1086_v16 }
 0x79a   :  { %1148 = vst [vmem:[%s1921_s2 + $0x1c] sm:$0xf] %v1087_v17  ;;  %1090 = vst [vmem:[#allocation2] sm:$0xf] %v1087_v17 }

</bundles_post_ra>
